<compile_context>
chip_gen: v7x
topology: tpu7x:2x2x1
jax: 0.10.0
libtpu: 0.0.40
codegen_flags: <defaults>
</compile_context>

<pallas_src>
import functools
from math import sqrt

import jax
import jax.numpy as jnp
from jax import lax
from jax.experimental import pallas as pl
from jax.experimental.pallas import tpu as pltpu


# ----------------------------- kernel body -----------------------------------

def _fourier_deconv_body(x_ref, w_ref, b_ref, o_ref, *, mix_channels, has_bias, eps):
    # x_ref: (2, Bt, C_in, TS)   stacked (real, imag) of fft(x)
    # w_ref: (C_out, TS)         raw weight tile
    # b_ref: (C_out, 1)          real bias (only when has_bias)
    # o_ref: (2, Bt, C_out, TS)  stacked (real, imag) of the output tile
    inv = 1.0 / (w_ref[...] + eps)                        # exact; VPU/EUP slack -> free

    if mix_channels:
        # all-ones 1x1x1 conv over channels == sum over input channels,
        # broadcast to every output channel (VPU/XLU; MXU would be <4% utilized).
        xr = jnp.sum(x_ref[0], axis=1, keepdims=True)     # (Bt, 1, TS)
        xi = jnp.sum(x_ref[1], axis=1, keepdims=True)
    else:
        xr = x_ref[0]                                     # (Bt, C_out, TS)
        xi = x_ref[1]

    out_r = xr * inv[None]                                # (Bt, C_out, TS)
    out_i = xi * inv[None]
    if has_bias:
        out_r = out_r + b_ref[...][None]                  # bias -> real part only

    o_ref[0] = out_r.astype(o_ref.dtype)
    o_ref[1] = out_i.astype(o_ref.dtype)


def _fourier_deconv_bias_kernel(x_ref, w_ref, b_ref, o_ref, *, mix_channels, eps):
    _fourier_deconv_body(x_ref, w_ref, b_ref, o_ref,
                         mix_channels=mix_channels, has_bias=True, eps=eps)


def _fourier_deconv_nobias_kernel(x_ref, w_ref, o_ref, *, mix_channels, eps):
    _fourier_deconv_body(x_ref, w_ref, None, o_ref,
                         mix_channels=mix_channels, has_bias=False, eps=eps)


# ----------------------------- tiling heuristics ------------------------------

def _derive_tiling(B, C_in, C_out, S_pad):
    """Generation-aware batch/spatial tiling from the VMEM budget."""
    try:
        vmem_cap = int(pltpu.get_tpu_info().vmem_capacity_bytes)
    except Exception:
        vmem_cap = 64 * 1024 * 1024                 # conservative (v7x-sized) fallback
    if vmem_cap >= 100 * 1024 * 1024:               # v5e / v6e: 128 MiB physical
        vmem_limit = 100 * 1024 * 1024
    else:                                           # v7x: 64 MiB physical
        vmem_limit = 44 * 1024 * 1024
    block_budget = (vmem_limit * 3) // 4            # headroom for compiler scratch

    Bt = min(B, 8)
    cin_p = -(-C_in // 8) * 8                       # sublane-padded channel counts
    cout_p = -(-C_out // 8) * 8
    # double-buffered f32 bytes per spatial element:
    #   x (2*Bt*C_in) + weight (C_out) + out (2*Bt*C_out)
    per_ts = 4 * 2 * (2 * Bt * cin_p + cout_p + 2 * Bt * cout_p)
    TS = min(S_pad, max(128, (block_budget // per_ts) // 128 * 128))

    n_b = -(-B // Bt)
    n_s = -(-S_pad // TS)
    # keep >= 2 grid steps when possible so both v7x TensorCores get work
    if n_s * n_b < 2 and TS >= 256:
        TS = max(128, (TS // 2) // 128 * 128)
        n_s = -(-S_pad // TS)
    return TS, Bt, n_s, n_b, vmem_limit


# ----------------------------- wrapper ----------------------------------------

def fourier_deconv3d(x, weight, bias=None, *, eps=1e-5, padding=None,
                     pre_fft=True, post_ifft=False):
    """x: (B, C_in, D, H, W) float32. weight: (C_out, Dk, Hk, Wk). bias: (C_out,) or None."""
    B, C_in = x.shape[:2]
    C_out = weight.shape[0]

    # TODO(synk): 3D FFT has no Pallas equivalent; stays as jnp.fft glue.
    xc = jnp.fft.fftn(x, axes=(-3, -2, -1)) if pre_fft else x.astype(jnp.complex64)

    if padding is not None:                         # torch-style pad of last 3 dims
        pD, pH, pW = padding
        xc = jnp.pad(xc, ((0, 0), (0, 0), (pD, pD), (pH, pH), (pW, pW)))

    D, H, W = xc.shape[2:]
    assert weight.shape[1:] == (D, H, W), "kernel_size must match (padded) spatial dims"
    S = D * H * W
    S_pad = -(-S // 128) * 128                      # lane alignment; raggedness handled by cdiv grid

    # Single fused extraction pass: stacked (real, imag) -> (2, B, C_in, S_pad).
    xs = jnp.stack([jnp.real(xc), jnp.imag(xc)]).astype(jnp.float32).reshape(2, B, C_in, S)
    w2 = weight.astype(jnp.float32).reshape(C_out, S)
    if S_pad != S:
        xs = jnp.pad(xs, ((0, 0), (0, 0), (0, 0), (0, S_pad - S)))
        w2 = jnp.pad(w2, ((0, 0), (0, S_pad - S)), constant_values=1.0)

    TS, Bt, n_s, n_b, vmem_limit = _derive_tiling(B, C_in, C_out, S_pad)
    mix_channels = (C_out != C_in)
    has_bias = bias is not None

    in_specs = [
        pl.BlockSpec((2, Bt, C_in, TS), lambda s, b: (0, b, 0, s)),
        pl.BlockSpec((C_out, TS), lambda s, b: (0, s)),
    ]
    args = [xs, w2]
    if has_bias:
        in_specs.append(pl.BlockSpec((C_out, 1), lambda s, b: (0, 0)))
        args.append(bias.astype(jnp.float32).reshape(C_out, 1))
        kernel = functools.partial(_fourier_deconv_bias_kernel,
                                   mix_channels=mix_channels, eps=float(eps))
    else:
        kernel = functools.partial(_fourier_deconv_nobias_kernel,
                                   mix_channels=mix_channels, eps=float(eps))

    out_stacked = pl.pallas_call(
        kernel,
        out_shape=jax.ShapeDtypeStruct((2, B, C_out, S_pad), jnp.float32),
        grid_spec=pltpu.PrefetchScalarGridSpec(
            num_scalar_prefetch=0,
            # S tiles outer, batch inner: weight / bias block indices are
            # unchanged across consecutive (batch) steps -> DMA'd once per S tile.
            grid=(n_s, n_b),
            in_specs=in_specs,
            out_specs=pl.BlockSpec((2, Bt, C_out, TS), lambda s, b: (0, b, 0, s)),
        ),
        compiler_params=pltpu.CompilerParams(
            dimension_semantics=("parallel", "parallel"),
            vmem_limit_bytes=vmem_limit),
    )(*args)

    # TODO(synk): complex pack stays as one XLA pass (Mosaic has no complex dtype).
    out_r = out_stacked[0, :, :, :S].reshape(B, C_out, D, H, W)
    out_i = out_stacked[1, :, :, :S].reshape(B, C_out, D, H, W)
    out = lax.complex(out_r, out_i)
    if post_ifft:
        out = jnp.fft.ifftn(out, axes=(-3, -2, -1))
    return out


def fourier_deconv3d_reference(x, weight, bias, *, eps=1e-5):
    """Pure-JAX reference matching the module semantics."""
    B, C_in = x.shape[:2]
    C_out = weight.shape[0]
    xc = jnp.fft.fftn(x, axes=(-3, -2, -1))
    if C_out != C_in:
        xc = jnp.broadcast_to(jnp.sum(xc, axis=1, keepdims=True),
                              (B, C_out) + x.shape[2:])
    out = xc / (weight[None].astype(jnp.float32) + eps)
    if bias is not None:
        out = out + bias[None, :, None, None, None].astype(jnp.float32)
    return out


if __name__ == "__main__":
    # Small shapes consistent with the module: B=2, C_in=4, C_out=6,
    # spatial D=H=W=16, kernel_size=(16,16,16) (must match spatial dims).
    B, C_in, C_out = 2, 4, 6
    D = H = W = 16
    eps = 1e-5

    key = jax.random.PRNGKey(0)
    kx, kw, kb, kw2 = jax.random.split(key, 4)

    x = jax.random.normal(kx, (B, C_in, D, H, W), dtype=jnp.float32)

    # Deterministic kaiming_uniform_(a=sqrt(5)) style init for weight (C_out, D, H, W)
    fan_in = D * H * W                       # torch fan_in for shape (C_out, D, H, W)
    gain = sqrt(2.0 / (1.0 + 5.0))
    w_bound = gain * sqrt(3.0) / sqrt(fan_in)
    b_bound = 1.0 / sqrt(fan_in)

    # --- case 1: channel-mixing path (C_out != C_in), with bias ---
    weight = jax.random.uniform(kw, (C_out, D, H, W), minval=-w_bound,
                                maxval=w_bound, dtype=jnp.float32)
    bias = jax.random.uniform(kb, (C_out,), minval=-b_bound, maxval=b_bound,
                              dtype=jnp.float32)
    out = jax.block_until_ready(fourier_deconv3d(x, weight, bias, eps=eps))
    ref = fourier_deconv3d_reference(x, weight, bias, eps=eps)
    assert out.shape == (B, C_out, D, H, W) and out.dtype == jnp.complex64
    assert jnp.allclose(out, ref, rtol=1e-3, atol=1e-3), "mismatch (mix) vs reference"

    # --- case 2: no channel mix (C_out == C_in), no bias ---
    weight2 = jax.random.uniform(kw2, (C_in, D, H, W), minval=-w_bound,
                                 maxval=w_bound, dtype=jnp.float32)
    out2 = jax.block_until_ready(fourier_deconv3d(x, weight2, None, eps=eps))
    ref2 = fourier_deconv3d_reference(x, weight2, None, eps=eps)
    assert out2.shape == (B, C_in, D, H, W) and out2.dtype == jnp.complex64
    assert jnp.allclose(out2, ref2, rtol=1e-3, atol=1e-3), "mismatch (no-mix) vs reference"

    print("KERNEL_OK")
</pallas_src>

<mosaic_0001>
module attributes {stable_mosaic.version = 11 : i64} {
  func.func @_fourier_deconv_bias_kernel(%arg0: i32, %arg1: i32, %arg2: memref<2x2x4x2048xf32, #tpu.memory_space<vmem>>, %arg3: memref<6x2048xf32, #tpu.memory_space<vmem>>, %arg4: memref<6x1xf32, #tpu.memory_space<vmem>>, %arg5: memref<2x2x6x2048xf32, #tpu.memory_space<vmem>>) attributes {dimension_semantics = [#tpu.dimension_semantics<parallel>, #tpu.dimension_semantics<parallel>], iteration_bounds = array<i64: 2, 1>, scalar_prefetch = 0 : i64, scratch_operands = 0 : i64, tpu.core_type = #tpu.core_type<tc>, window_params = [{transform_indices = @transform_0, window_bounds = array<i64: 2, 2, 4, 2048>}, {transform_indices = @transform_1, window_bounds = array<i64: 6, 2048>}, {pipeline_mode = #tpu.pipeline_mode<synchronous>, transform_indices = @transform_2, window_bounds = array<i64: 6, 1>}, {transform_indices = @transform_3, window_bounds = array<i64: 2, 2, 6, 2048>}]} {
    %c0 = arith.constant 0 : index
    %c0_0 = arith.constant 0 : index
    %0 = vector.load %arg3[%c0, %c0_0] : memref<6x2048xf32, #tpu.memory_space<vmem>>, vector<6x2048xf32>
    %cst = arith.constant 9.99999974E-6 : f32
    %1 = vector.broadcast %cst : f32 to vector<6x2048xf32>
    %2 = arith.addf %0, %1 : vector<6x2048xf32>
    %cst_1 = arith.constant 1.000000e+00 : f32
    %3 = vector.broadcast %cst_1 : f32 to vector<6x2048xf32>
    %4 = arith.divf %3, %2 : vector<6x2048xf32>
    %c0_2 = arith.constant 0 : index
    %c0_3 = arith.constant 0 : index
    %c0_4 = arith.constant 0 : index
    %c0_5 = arith.constant 0 : index
    %5 = vector.load %arg2[%c0_2, %c0_3, %c0_4, %c0_5] : memref<2x2x4x2048xf32, #tpu.memory_space<vmem>>, vector<1x2x4x2048xf32>
    %6 = vector.shape_cast %5 : vector<1x2x4x2048xf32> to vector<2x4x2048xf32>
    %cst_6 = arith.constant dense<0.000000e+00> : vector<2x2048xf32>
    %7 = vector.multi_reduction <add>, %6, %cst_6 [1] : vector<2x4x2048xf32> to vector<2x2048xf32>
    %8 = vector.shape_cast %7 : vector<2x2048xf32> to vector<2x1x2048xf32>
    %c1 = arith.constant 1 : index
    %c0_7 = arith.constant 0 : index
    %c0_8 = arith.constant 0 : index
    %c0_9 = arith.constant 0 : index
    %9 = vector.load %arg2[%c1, %c0_7, %c0_8, %c0_9] : memref<2x2x4x2048xf32, #tpu.memory_space<vmem>>, vector<1x2x4x2048xf32>
    %10 = vector.shape_cast %9 : vector<1x2x4x2048xf32> to vector<2x4x2048xf32>
    %cst_10 = arith.constant dense<0.000000e+00> : vector<2x2048xf32>
    %11 = vector.multi_reduction <add>, %10, %cst_10 [1] : vector<2x4x2048xf32> to vector<2x2048xf32>
    %12 = vector.shape_cast %11 : vector<2x2048xf32> to vector<2x1x2048xf32>
    %13 = vector.shape_cast %4 : vector<6x2048xf32> to vector<1x6x2048xf32>
    %14 = vector.broadcast %8 : vector<2x1x2048xf32> to vector<2x6x2048xf32>
    %15 = vector.broadcast %13 : vector<1x6x2048xf32> to vector<2x6x2048xf32>
    %16 = arith.mulf %14, %15 : vector<2x6x2048xf32>
    %17 = vector.shape_cast %4 : vector<6x2048xf32> to vector<1x6x2048xf32>
    %18 = vector.broadcast %12 : vector<2x1x2048xf32> to vector<2x6x2048xf32>
    %19 = vector.broadcast %17 : vector<1x6x2048xf32> to vector<2x6x2048xf32>
    %20 = arith.mulf %18, %19 : vector<2x6x2048xf32>
    %c0_11 = arith.constant 0 : index
    %c0_12 = arith.constant 0 : index
    %21 = vector.load %arg4[%c0_11, %c0_12] : memref<6x1xf32, #tpu.memory_space<vmem>>, vector<6x1xf32>
    %22 = vector.shape_cast %21 : vector<6x1xf32> to vector<1x6x1xf32>
    %23 = vector.broadcast %22 : vector<1x6x1xf32> to vector<2x6x2048xf32>
    %24 = arith.addf %16, %23 : vector<2x6x2048xf32>
    %c0_13 = arith.constant 0 : index
    %c0_14 = arith.constant 0 : index
    %c0_15 = arith.constant 0 : index
    %c0_16 = arith.constant 0 : index
    %25 = vector.load %arg5[%c0_13, %c0_14, %c0_15, %c0_16] : memref<2x2x6x2048xf32, #tpu.memory_space<vmem>>, vector<1x2x6x2048xf32>
    %26 = vector.shape_cast %25 : vector<1x2x6x2048xf32> to vector<2x6x2048xf32>
    %27 = vector.shape_cast %24 : vector<2x6x2048xf32> to vector<1x2x6x2048xf32>
    tpu.vector_store %arg5[%c0_13, %c0_14, %c0_15, %c0_16], %27 {strides = array<i32>} : memref<2x2x6x2048xf32, #tpu.memory_space<vmem>>, vector<1x2x6x2048xf32>,
    %c1_17 = arith.constant 1 : index
    %c0_18 = arith.constant 0 : index
    %c0_19 = arith.constant 0 : index
    %c0_20 = arith.constant 0 : index
    %28 = vector.load %arg5[%c1_17, %c0_18, %c0_19, %c0_20] : memref<2x2x6x2048xf32, #tpu.memory_space<vmem>>, vector<1x2x6x2048xf32>
    %29 = vector.shape_cast %28 : vector<1x2x6x2048xf32> to vector<2x6x2048xf32>
    %30 = vector.shape_cast %20 : vector<2x6x2048xf32> to vector<1x2x6x2048xf32>
    tpu.vector_store %arg5[%c1_17, %c0_18, %c0_19, %c0_20], %30 {strides = array<i32>} : memref<2x2x6x2048xf32, #tpu.memory_space<vmem>>, vector<1x2x6x2048xf32>,
    return
  }
  func.func @transform_0(%arg0: i32, %arg1: i32) -> (i32, i32, i32, i32) {
    %c0_i32 = arith.constant 0 : i32
    %c0_i32_0 = arith.constant 0 : i32
    %c0_i32_1 = arith.constant 0 : i32
    return %c0_i32, %arg1, %c0_i32_0, %arg0 : i32, i32, i32, i32
  }
  func.func @transform_1(%arg0: i32, %arg1: i32) -> (i32, i32) {
    %c0_i32 = arith.constant 0 : i32
    %c0_i32_0 = arith.constant 0 : i32
    return %c0_i32, %arg0 : i32, i32
  }
  func.func @transform_2(%arg0: i32, %arg1: i32) -> (i32, i32) {
    %c0_i32 = arith.constant 0 : i32
    %c0_i32_0 = arith.constant 0 : i32
    %c0_i32_1 = arith.constant 0 : i32
    return %c0_i32, %c0_i32_0 : i32, i32
  }
  func.func @transform_3(%arg0: i32, %arg1: i32) -> (i32, i32, i32, i32) {
    %c0_i32 = arith.constant 0 : i32
    %c0_i32_0 = arith.constant 0 : i32
    %c0_i32_1 = arith.constant 0 : i32
    return %c0_i32, %arg1, %c0_i32_0, %arg0 : i32, i32, i32, i32
  }
}

</mosaic_0001>

<bundles_post_ra>
// kernel: tpu_custom_call.1
= control target key start
LH: loop header
LB: loop body
LE: loop exit
PB: predicated region body
PF: predicated region fallthrough
CT: control target
= control target key end

     0   :  { %8 = vsyncpa [#allocation3], 0  ;;  %s2763_s0 = inlined_call_operand.hbm [shape: f32[2,2,4,4096], index: 0, kind: input, shape index: {}]   ;;  %s2764_s1 = inlined_call_operand.hbm [shape: f32[6,4096], index: 1, kind: input, shape index: {}]   ;;  %s2765_s2 = inlined_call_operand.vmem [shape: f32[6,1], index: 2, kind: input, shape index: {}]   ;;  %s2766_s3 = inlined_call_operand.vmem [shape: f32[2,2,6,4096], index: 3, kind: output, shape index: {}]  }
   0x1   :  { %10 = vsyncpa [#allocation3 + $0x1], 0 }
   0x2   :  { %11 = vsyncpa [#allocation5], 0 }
   0x3   :  { %13 = vsyncpa [#allocation5 + $0x1], 0  ;;  %s1652_s12 = smov 0   ;;  %s1654_s13 = smov 0  }
   0x4   :  { %s1656_s14 = smov 0   ;;  %s1658_s15 = smov 0  }
   0x5   :  { %s1660_s16 = smov 0   ;;  %s1662_s17 = smov 0  }
   0x6 LB: > { %s1311_s18 = sadd.s32 4294967295, %s1624_s17   ;;  %s31_s19 = sadd.s32 1, %s1620_s16  ;;  %s1624_s17 = sphi %s1662_s17, %s19_s17   ;;  %s1620_s16 = sphi %s1660_s16, %s2917_s16   ;;  %s1616_s15 = sphi %s1658_s15, %s2916_s15   ;;  %s1612_s14 = sphi %s1656_s14, %s2915_s14   ;;  %s1608_s13 = sphi %s1654_s13, %s2914_s13   ;;  %s1604_s12 = sphi %s1652_s12, %s2913_s12  }
   0x7   : > { %p33_p0 = scmp.ge.s32.totalorder %s31_s19, 2  ;;  %s40_s20 = sadd.s32 1, %s1612_s14 }
   0x8   : > { %p47_p1 = scmp.ne.s32.totalorder %s1612_s14, %s1608_s13  ;;  %p48_p2 = scmp.eq.s32.totalorder %s1624_s17, 0 }
   0x9   : > { %s2919_s19 = smov (%p33_p0, %s31_s19), 0  ;;  %p53_p4 = scmp.ne.s32.totalorder %s1608_s13, %s1604_s12 }
   0xa   : > { %p1688_p3 = por %p48_p2, %p47_p1  ;;  %s36_s22 = ssub.s32 %s1620_s16, %s2919_s19 }
   0xb   : > { %p54_p5 = scmp.eq.s32.totalorder %s1311_s18, 0  ;;  %p38_p6 = scmp.eq.s32.totalorder %s36_s22, 0 }
   0xc   : > { %p126_p7 = scmp.eq.s32.totalorder %s1311_s18, 1  ;;  %p1392_p10 = scmp.lt.s32.totalorder %s1624_s17, 2 }
   0xd   : > { %p1695_p8 = por %p54_p5, %p53_p4  ;;  %s1708_s26 = sand.u32 1, %s1612_s14  }
   0xe   : > { %s1700_s24 = scalar_select %p38_p6, %s1612_s14, %s40_s20  }
   0xf   : > { %s2777_s23 = scalar_select %p1695_p8, 1, 0 }
  0x10   : > { %p1702_p9 = por %p126_p7, %p47_p1  ;;  %s1378_s27 = sshll.u32 %s1620_s16, 10 }
  0x11   : > { %s1315_s28 = sshll.u32 %s1708_s26, 8  ;;  %s1715_s4 = scalar_lea.hbm %s2763_s0, %s1378_s27 }
  0x12   : > { %s2778_s25 = scalar_select %p1702_p9, 1, 0 }
  0x13   : > { %s159_s5 = scalar_lea.vmem [#allocation2], %s1315_s28  ;;  %p1719_p11 = pnand %p1392_p10, %p1688_p3 }
  0x14   : > { %s169_s6 = sshll.u32 %s159_s5, 4  ;;  %s156_s8 = scalar_lea.sflag [#allocation3], %s1708_s26  ;;  %s1723_s6 = int_to_ptr.vmem [resolvable:$true] %s169_s6 }
  0x15   : > { %s1510_s9 = scalar_lea.hbm %s1715_s4, 4096  ;;  %p1512_p0 = pneg %p1719_p11 }
  0x16   : > { %p1511_p13 = scmp.ne.s32.totalorder %s1715_s4, %s1510_s9  ;;  %s1515_s12 = scalar_lea.hbm %s2763_s0, 8192 }
  0x17   : > { %p1516_p3 = scmp.lt.u32.totalorder %s1715_s4, %s2763_s0  ;;  %p1517_p4 = scmp.lt.u32.totalorder %s1515_s12, %s1510_s9 }
  0x18   : > { %p1513_p1 = pnand %p1512_p0, %p1511_p13  ;;  %p1519_p6 = scmp.lt.u32.totalorder %s1510_s9, %s1715_s4 }
  0x19   : > { %p1518_p5 = por %p1517_p4, %p1516_p3 }
  0x1a   : > { %p1514_p2 = pneg %p1513_p1 }
  0x1b   : > { %p1520_p7 = por %p1519_p6, %p1518_p5 }
  0x1d   : > { %p1521_p10 = pnand %p1520_p7, %p1514_p2 }
  0x1f   : > { %1524 = shalt.err (!%p1521_p10)
}
  0x20   : > { %s1525_s21 = scalar_lea.vmem %s1723_s6, 4096  ;;  %s1626_s22 = smov [#allocation2]  }
  0x21   : > { %p1526_p13 = scmp.ne.s32.totalorder %s1723_s6, %s1525_s21  ;;  %s1530_s27 = sshll.u32 %s1626_s22, 4  ;;  %s1531_s27 = int_to_ptr.vmem [resolvable:$false] %s1530_s27 }
  0x22   : > { %s1532_s28 = scalar_lea.vmem %s1531_s27, 8192  ;;  %p1533_p9 = scmp.lt.s32.totalorder %s1723_s6, %s1531_s27 }
  0x23   : > { %p1528_p1 = pnand %p1526_p13, %p1512_p0  ;;  %p1534_p3 = scmp.lt.s32.totalorder %s1532_s28, %s1525_s21 }
  0x25   : > { %p1529_p12 = pneg %p1528_p1  ;;  %p1535_p4 = por %p1534_p3, %p1533_p9 }
  0x27   : > { %p1536_p5 = pnand %p1535_p4, %p1529_p12 }
  0x29   : > { %1539 = shalt.err (!%p1536_p5)
}
  0x2a   : > { %s1627_s29 = smov 2048   ;;  %s1628_s30 = smov 1024  }
  0x2b   : > { %s1629_s5 = smov 64   ;;  %p196_p2 = scmp.lt.s32.totalorder %s1624_s17, 3 }
  0x2c   : > { %1388 = dma.hbm_to_vmem [thread:$0]  (!%p1719_p11), %s1715_s4, 4096, %s1723_s6, %s156_s8, %s1627_s29, %s1628_s30, %s1629_s5  }
  0x2d   : > { %s1318_s9 = sshll.u32 %s1708_s26, 7  ;;  %s1379_s10 = sshll.u32 %s1620_s16, 11 }
  0x2e   : > { %p2780_p9 = scmp.ge.s32.totalorder %s1624_s17, 1  ;;  %s1766_s20 = scalar_lea.hbm %s2764_s1, %s1379_s10 }
  0x2f   : > { %s183_s21 = scalar_lea.vmem [#allocation4], %s1318_s9  ;;  %s180_s4 = scalar_lea.sflag [#allocation5], %s1708_s26 }
  0x30   : > { %p1759_p12 = pnand %p2780_p9, %p196_p2  ;;  %s191_s22 = sshll.u32 %s183_s21, 4  ;;  %s192_s22 = int_to_ptr.vmem [resolvable:$true] %s191_s22 }
  0x31   : > { %s1540_s6 = scalar_lea.hbm %s1766_s20, 2048  ;;  %s1545_s28 = scalar_lea.hbm %s2764_s1, 4096 }
  0x32   : > { %s2781_s11 = scalar_select %p1759_p12, 1, 0 }
  0x33   : > { %p1541_p6 = scmp.ne.s32.totalorder %s1766_s20, %s1540_s6  ;;  %p1546_p13 = scmp.lt.u32.totalorder %s1766_s20, %s2764_s1 }
  0x34   : > { %p1547_p1 = scmp.lt.u32.totalorder %s1545_s28, %s1540_s6  ;;  %p1549_p4 = scmp.lt.u32.totalorder %s1540_s6, %s1766_s20 }
  0x35   : > { %p1543_p7 = pnand %p1541_p6, %p1512_p0 }
  0x36   : > { %p1548_p3 = por %p1547_p1, %p1546_p13 }
  0x37   : > { %p1544_p10 = pneg %p1543_p7 }
  0x38   : > { %p1550_p5 = por %p1549_p4, %p1548_p3 }
  0x3a   : > { %p1551_p2 = pnand %p1550_p5, %p1544_p10 }
  0x3c   : > { %1554 = shalt.err (!%p1551_p2)
}
  0x3d   : > { %s1555_s26 = scalar_lea.vmem %s192_s22, 2048  ;;  %s1630_s5 = smov [#allocation4]  }
  0x3e   : > { %p1556_p9 = scmp.ne.s32.totalorder %s192_s22, %s1555_s26  ;;  %s1560_s9 = sshll.u32 %s1630_s5, 4  ;;  %s1561_s9 = int_to_ptr.vmem [resolvable:$false] %s1560_s9 }
  0x3f   : > { %s1562_s10 = scalar_lea.vmem %s1561_s9, 4096  ;;  %p1563_p8 = scmp.lt.s32.totalorder %s192_s22, %s1561_s9 }
  0x40   : > { %p1558_p6 = pnand %p1556_p9, %p1512_p0  ;;  %p1564_p12 = scmp.lt.s32.totalorder %s1562_s10, %s1555_s26 }
  0x42   : > { %p1559_p7 = pneg %p1558_p6  ;;  %p1565_p1 = por %p1564_p12, %p1563_p8 }
  0x44   : > { %p1566_p13 = pnand %p1565_p1, %p1559_p7 }
  0x46   : > { %1569 = shalt.err (!%p1566_p13)
}
  0x47   : > { %1391 = dma.hbm_to_vmem [thread:$0]  (!%p1719_p11), %s1766_s20, 2048, %s192_s22, %s180_s4  }
  0x48   : > { %p2782_p10 = scmp.ne.s32.totalorder %s2781_s11, 0 }
  0x4a   : > { %200 = sbr.rel (%p2782_p10) target bundleno = 302 (0x12e), region = 32 }
  0x51   : > { %s1791_s12 = sand.u32 1, %s1608_s13   ;;  %p2783_p8 = scmp.ne.s32.totalorder %s2777_s23, 0 }
  0x52   : > { %s1322_s18 = sshll.u32 %s1791_s12, 8  ;;  %s203_s21 = scalar_lea.sflag [#allocation3], %s1791_s12 }
  0x53   : > { %s1795_s6 = scalar_lea.vmem [#allocation2], %s1322_s18 }
  0x54   : > { %1595 = dma.done.wait (%p2783_p8), %s203_s21, 4096  }
  0x55   : > { %1597 = vsyncadd (%p2783_p8), %s203_s21, 4294963200  ;;  %s1323_s7 = sshll.u32 %s1791_s12, 7  ;;  %s212_s11 = scalar_lea.sflag [#allocation5], %s1791_s12 }
  0x56   : > { %s215_s20 = scalar_lea.vmem [#allocation4], %s1323_s7 }
  0x57   : > { %1599 = dma.done.wait (%p2783_p8), %s212_s11, 2048  }
  0x58   : > { %1601 = vsyncadd (%p2783_p8), %s212_s11, 4294965248  ;;  %v1631_v0 = vmov 0   ;;  %v953_v1 = vld [vmem:[%s2765_s2] sm:$0x3f]  ;;  %v248_v3 = vld [vmem:[%s215_s20 + $0x8] sm:$0x3f] }
  0x59   : > { %1445 = vset.pattern.permute.xlu0 %v1631_v0  ;;  %v247_v2 = vld [vmem:[%s215_s20] sm:$0x3f]  ;;  %vm375_vm0 = vcmask 1043456   ;;  %v249_v4 = vld [vmem:[%s215_s20 + $0x10] sm:$0x3f]  ;;  %v1814_v21 = vld [vmem:[%s1795_s6 + $0x8] sm:$0xff] }
  0x5a   : > { %956 = vperm.xlu0 %1445, %v953_v1   ;;  %v250_v5 = vld [vmem:[%s215_s20 + $0x18] sm:$0x3f]  ;;  %v251_v6 = vld [vmem:[%s215_s20 + $0x20] sm:$0x3f]  ;;  %v252_v8 = vld [vmem:[%s215_s20 + $0x28] sm:$0x3f]  ;;  %v344_v39 = vcombine.high %v1814_v21, %v1814_v21 }
  0x5b   : > { %v1811_v7 = vld [vmem:[%s1795_s6] sm:$0xff]  ;;  %v253_v9 = vld [vmem:[%s215_s20 + $0x30] sm:$0x3f]  ;;  %v254_v10 = vld [vmem:[%s215_s20 + $0x38] sm:$0x3f]  ;;  %s1324_s23 = sshll.u32 %s1791_s12, 9 }
  0x5c   : > { %v255_v11 = vld [vmem:[%s215_s20 + $0x40] sm:$0x3f]  ;;  %v256_v12 = vld [vmem:[%s215_s20 + $0x48] sm:$0x3f]  ;;  %v257_v13 = vld [vmem:[%s215_s20 + $0x50] sm:$0x3f]  ;;  %v343_v25 = vcombine.high %v1811_v7, %v1811_v7 }
  0x5d   : > { %v258_v14 = vld [vmem:[%s215_s20 + $0x58] sm:$0x3f]  ;;  %v259_v15 = vld [vmem:[%s215_s20 + $0x60] sm:$0x3f]  ;;  %v260_v16 = vld [vmem:[%s215_s20 + $0x68] sm:$0x3f] }
  0x5e   : > { %v261_v17 = vld [vmem:[%s215_s20 + $0x70] sm:$0x3f]  ;;  %v262_v18 = vld [vmem:[%s215_s20 + $0x78] sm:$0x3f]  ;;  %v263_v19 = vadd.f32 1e-05, %v247_v2 }
  0x5f   : > { %v264_v20 = vadd.f32 1e-05, %v248_v3  ;;  %v265_v22 = vadd.f32 1e-05, %v249_v4  ;;  %v266_v23 = vadd.f32 1e-05, %v250_v5 }
  0x60   : > { %v267_v24 = vadd.f32 1e-05, %v251_v6  ;;  %v268_v26 = vadd.f32 1e-05, %v252_v8  ;;  %v269_v27 = vadd.f32 1e-05, %v253_v9  ;;  %1478 = vrcp.f32 %v263_v19 }
  0x61   : > { %v270_v28 = vadd.f32 1e-05, %v254_v10  ;;  %v271_v29 = vadd.f32 1e-05, %v255_v11  ;;  %v272_v30 = vadd.f32 1e-05, %v256_v12  ;;  %1480 = vrcp.f32 %v264_v20 }
  0x62   : > { %v273_v31 = vadd.f32 1e-05, %v257_v13  ;;  %v274_v32 = vadd.f32 1e-05, %v258_v14  ;;  %v275_v33 = vadd.f32 1e-05, %v259_v15  ;;  %1482 = vrcp.f32 %v265_v22 }
  0x63   : > { %v276_v34 = vadd.f32 1e-05, %v260_v16  ;;  %v277_v35 = vadd.f32 1e-05, %v261_v17  ;;  %v1818_v36 = vadd.f32 1e-05, %v262_v18  ;;  %1484 = vrcp.f32 %v266_v23 }
  0x64   : > { %v313_v37 = vld [vmem:[%s1795_s6 + $0x10] sm:$0xff]  ;;  %v1822_v38 = vld [vmem:[%s1795_s6 + $0x18] sm:$0xff]  ;;  %1486 = vrcp.f32 %v267_v24  ;;  %v1827_v40 = vld [vmem:[%s1795_s6 + $0x20] sm:$0xff]  ;;  %v376_v45 = vsel %vm375_vm0, %v1811_v7, 0.0  ;;  %v383_v4 = vsel %vm375_vm0, %v343_v25, 0.0  ;;  %v390_v5 = vsel %vm375_vm0, %v1814_v21, 0.0 }
  0x65   : > { %v1830_v41 = vld [vmem:[%s1795_s6 + $0x28] sm:$0xff]  ;;  %v1833_v42 = vld [vmem:[%s1795_s6 + $0x30] sm:$0xff]  ;;  %v345_v43 = vcombine.high %v313_v37, %v313_v37  ;;  %v346_v44 = vcombine.high %v1822_v38, %v1822_v38  ;;  %1488 = vrcp.f32 %v268_v26  ;;  %v1840_v46 = vld [vmem:[%s1795_s6 + $0x38] sm:$0xff]  ;;  %v347_v49 = vcombine.high %v1827_v40, %v1827_v40  ;;  %s2433_s8 = scalar_lea.vmem [#allocation6], %s1324_s23  ;;  %p2912_p11 = scmp.ne.s32.totalorder %s2778_s25, 0 }
  0x66   : > { %v1843_v47 = vld [vmem:[%s1795_s6 + $0x40] sm:$0xff]  ;;  %v1846_v48 = vld [vmem:[%s1795_s6 + $0x48] sm:$0xff]  ;;  %v348_v50 = vcombine.high %v1830_v41, %v1830_v41  ;;  %v349_v51 = vcombine.high %v1833_v42, %v1833_v42  ;;  %1490 = vrcp.f32 %v269_v27  ;;  %v1855_v52 = vld [vmem:[%s1795_s6 + $0x50] sm:$0xff]  ;;  %v350_v55 = vcombine.high %v1840_v46, %v1840_v46  ;;  %s1380_s27 = sshll.u32 (%p2912_p11), %s1616_s15, 7 }
  0x67   : > { %v1858_v53 = vld [vmem:[%s1795_s6 + $0x58] sm:$0xff]  ;;  %v1861_v54 = vld [vmem:[%s1795_s6 + $0x60] sm:$0xff]  ;;  %v351_v56 = vcombine.high %v1843_v47, %v1843_v47  ;;  %v352_v57 = vcombine.high %v1846_v48, %v1846_v48  ;;  %1492 = vrcp.f32 %v270_v28  ;;  %v1870_v58 = vld [vmem:[%s1795_s6 + $0x68] sm:$0xff]  ;;  %v353_v61 = vcombine.high %v1855_v52, %v1855_v52  ;;  %s2618_s30 = scalar_lea.vmem (%p2912_p11), %s2766_s3, %s1380_s27 }
  0x68   : > { %v1873_v59 = vld [vmem:[%s1795_s6 + $0x70] sm:$0xff]  ;;  %v1876_v60 = vld [vmem:[%s1795_s6 + $0x78] sm:$0xff]  ;;  %v354_v62 = vcombine.high %v1858_v53, %v1858_v53  ;;  %1494 = vrcp.f32 %v271_v29  ;;  %v377_v3 = vrot.slane %v376_v45, 4  ;;  %v384_v7 = vrot.slane %v383_v4, 4 }
  0x69   : > { %1496 = vrcp.f32 %v272_v30  ;;  %v391_v8 = vrot.slane %v390_v5, 4  ;;  %v397_v9 = vsel %vm375_vm0, %v344_v39, 0.0  ;;  %v404_v13 = vsel %vm375_vm0, %v313_v37, 0.0 }
  0x6a   : > { %v1893_v6 = vpop.eup %1478  ;;  %1498 = vrcp.f32 %v273_v31  ;;  %v378_v11 = vadd.f32 %v377_v3, %v376_v45  ;;  %v398_v12 = vrot.slane %v397_v9, 4  ;;  %v385_v15 = vadd.f32 %v384_v7, %v383_v4 }
  0x6b   : > { %v1896_v10 = vpop.eup %1480  ;;  %1500 = vrcp.f32 %v274_v32  ;;  %v392_v16 = vadd.f32 %v391_v8, %v390_v5  ;;  %v405_v17 = vrot.slane %v404_v13, 4  ;;  %v411_v21 = vsel %vm375_vm0, %v345_v43, 0.0 }
  0x6c   : > { %v1899_v14 = vpop.eup %1482  ;;  %1502 = vrcp.f32 %v275_v33  ;;  %v379_v19 = vrot.slane %v378_v11, 2  ;;  %v399_v20 = vadd.f32 %v398_v12, %v397_v9  ;;  %v386_v23 = vrot.slane %v385_v15, 2 }
  0x6d   : > { %v1901_v18 = vpop.eup %1484  ;;  %1504 = vrcp.f32 %v276_v34  ;;  %v393_v24 = vrot.slane %v392_v16, 2  ;;  %v406_v25 = vadd.f32 %v405_v17, %v404_v13  ;;  %v412_v29 = vrot.slane %v411_v21, 4 }
  0x6e   : > { %v1904_v22 = vpop.eup %1486  ;;  %1506 = vrcp.f32 %v277_v35  ;;  %v380_v27 = vadd.f32 %v379_v19, %v378_v11  ;;  %v400_v28 = vrot.slane %v399_v20, 2  ;;  %v387_v31 = vadd.f32 %v386_v23, %v385_v15 }
  0x6f   : > { %v1906_v26 = vpop.eup %1488  ;;  %1508 = vrcp.f32 %v1818_v36  ;;  %v394_v32 = vadd.f32 %v393_v24, %v392_v16  ;;  %v407_v33 = vrot.slane %v406_v25, 2  ;;  %v418_v34 = vsel %vm375_vm0, %v1822_v38, 0.0 }
  0x70   : > { %v1909_v30 = vpop.eup %1490  ;;  %v381_v35 = vrot.slane %v380_v27, 1  ;;  %v401_v39 = vadd.f32 %v400_v28, %v399_v20  ;;  %v413_v43 = vadd.f32 %v412_v29, %v411_v21  ;;  %v419_v45 = vrot.slane %v418_v34, 4 }
  0x71   : > { %v1913_v37 = vpop.eup %1492  ;;  %v388_v36 = vrot.slane %v387_v31, 1  ;;  %v395_v4 = vrot.slane %v394_v32, 1  ;;  %v408_v5 = vadd.f32 %v407_v33, %v406_v25  ;;  %v425_v7 = vsel %vm375_vm0, %v346_v44, 0.0 }
  0x72   : > { %v1915_v3 = vpop.eup %1494  ;;  %v1923_v9 = vadd.f32 %v381_v35, %v380_v27  ;;  %v402_v11 = vrot.slane %v401_v39, 1  ;;  %v414_v12 = vrot.slane %v413_v43, 2  ;;  %v420_v13 = vadd.f32 %v419_v45, %v418_v34 }
  0x73   : > { %2784 = vst [vmem:[#allocation9_spill] sm:$0xff] %v1915_v3  ;;  %v1921_v8 = vpop.eup %1496  ;;  %v1927_v16 = vadd.f32 %v388_v36, %v387_v31  ;;  %v1929_v17 = vadd.f32 %v395_v4, %v394_v32  ;;  %v409_v19 = vrot.slane %v408_v5, 1  ;;  %v426_v20 = vrot.slane %v425_v7, 4 }
  0x74   : > { %2785 = vst [vmem:[#allocation10_spill] sm:$0xff] %v1921_v8  ;;  %v1925_v15 = vpop.eup %1498  ;;  %v1933_v38 = vadd.f32 %v402_v11, %v401_v39  ;;  %v415_v44 = vadd.f32 %v414_v12, %v413_v43  ;;  %v421_v23 = vrot.slane %v420_v13, 2  ;;  %v432_v24 = vsel %vm375_vm0, %v1827_v40, 0.0 }
  0x75   : > { %2786 = vst [vmem:[#allocation11_spill] sm:$0xff] %v1925_v15  ;;  %v1931_v21 = vpop.eup %1500  ;;  %v1939_v27 = vadd.f32 %v409_v19, %v408_v5  ;;  %v427_v28 = vadd.f32 %v426_v20, %v425_v7  ;;  %v433_v29 = vrot.slane %v432_v24, 4  ;;  %v439_v31 = vsel %vm375_vm0, %v347_v49, 0.0 }
  0x76   : > { %2787 = vst [vmem:[#allocation12_spill] sm:$0xff] %v1931_v21  ;;  %v1937_v25 = vpop.eup %1502  ;;  %v416_v33 = vrot.slane %v415_v44, 1  ;;  %v422_v34 = vadd.f32 %v421_v23, %v420_v13  ;;  %v440_v35 = vrot.slane %v439_v31, 4  ;;  %v446_v39 = vsel %vm375_vm0, %v1830_v41, 0.0 }
  0x77   : > { %2788 = vst [vmem:[#allocation13_spill] sm:$0xff] %v1937_v25  ;;  %v1945_v32 = vpop.eup %1504  ;;  %v428_v45 = vrot.slane %v427_v28, 2  ;;  %v434_v36 = vadd.f32 %v433_v29, %v432_v24  ;;  %v447_v4 = vrot.slane %v446_v39, 4  ;;  %v453_v40 = vsel %vm375_vm0, %v348_v50, 0.0 }
  0x78   : > { %2789 = vst [vmem:[#allocation14_spill] sm:$0xff] %v1945_v32  ;;  %v1949_v43 = vpop.eup %1506  ;;  %v1957_v49 = vadd.f32 %v416_v33, %v415_v44  ;;  %v423_v7 = vrot.slane %v422_v34, 1  ;;  %v441_v11 = vadd.f32 %v440_v35, %v439_v31  ;;  %v454_v12 = vrot.slane %v453_v40, 4 }
  0x79   : > { %2790 = vst [vmem:[#allocation15_spill] sm:$0xff] %v1949_v43  ;;  %v1955_v5 = vpop.eup %1508  ;;  %v429_v13 = vadd.f32 %v428_v45, %v427_v28  ;;  %v435_v19 = vrot.slane %v434_v36, 2  ;;  %v448_v20 = vadd.f32 %v447_v4, %v446_v39  ;;  %v460_v23 = vsel %vm375_vm0, %v1833_v42, 0.0 }
  0x7a   : > { %2791 = vst [vmem:[#allocation16_spill] sm:$0xff] %v1955_v5  ;;  %v1961_v24 = vadd.f32 %v423_v7, %v422_v34  ;;  %v442_v29 = vrot.slane %v441_v11, 2  ;;  %v455_v2 = vadd.f32 %v454_v12, %v453_v40  ;;  %v461_v41 = vrot.slane %v460_v23, 4 }
  0x7b   : > { %v430_v1 = vrot.slane %v429_v13, 1  ;;  %v436_v50 = vadd.f32 %v435_v19, %v434_v36  ;;  %v449_v0 = vrot.slane %v448_v20, 2  ;;  %v467_v44 = vsel %vm375_vm0, %v349_v51, 0.0 }
  0x7c   : > { %v443_v31 = vadd.f32 %v442_v29, %v441_v11  ;;  %v456_v28 = vrot.slane %v455_v2, 2  ;;  %v462_v33 = vadd.f32 %v461_v41, %v460_v23  ;;  %v468_v35 = vrot.slane %v467_v44, 4 }
  0x7d   : > { %v1967_v39 = vadd.f32 %v430_v1, %v429_v13  ;;  %v437_v45 = vrot.slane %v436_v50, 1  ;;  %v450_v34 = vadd.f32 %v449_v0, %v448_v20  ;;  %v474_v4 = vsel %vm375_vm0, %v1840_v46, 0.0 }
  0x7e   : > { %v444_v40 = vrot.slane %v443_v31, 1  ;;  %v457_v7 = vadd.f32 %v456_v28, %v455_v2  ;;  %v463_v36 = vrot.slane %v462_v33, 2  ;;  %v469_v12 = vadd.f32 %v468_v35, %v467_v44 }
  0x7f   : > { %v1971_v19 = vadd.f32 %v437_v45, %v436_v50  ;;  %v451_v42 = vrot.slane %v450_v34, 1  ;;  %v475_v63 = vrot.slane %v474_v4, 4  ;;  %v481_v51 = vsel %vm375_vm0, %v350_v55, 0.0 }
  0x80   : > { %v1977_v1 = vadd.f32 %v444_v40, %v443_v31  ;;  %v458_v11 = vrot.slane %v457_v7, 1  ;;  %v464_v0 = vadd.f32 %v463_v36, %v462_v33  ;;  %v470_v13 = vrot.slane %v469_v12, 2 }
  0x81   : > { %v1979_v20 = vadd.f32 %v451_v42, %v450_v34  ;;  %v476_v23 = vadd.f32 %v475_v63, %v474_v4  ;;  %v482_v2 = vrot.slane %v481_v51, 4  ;;  %v488_v29 = vsel %vm375_vm0, %v1843_v47, 0.0 }
  0x82   : > { %2792 = vst [vmem:[#allocation17_spill] sm:$0xff] %v1977_v1  ;;  %v1983_v41 = vadd.f32 %v458_v11, %v457_v7  ;;  %v465_v50 = vrot.slane %v464_v0, 1  ;;  %v471_v44 = vadd.f32 %v470_v13, %v469_v12  ;;  %v489_v28 = vrot.slane %v488_v29, 4 }
  0x83   : > { %2793 = vst [vmem:[#allocation18_spill] sm:$0xff] %v1979_v20  ;;  %v477_v46 = vrot.slane %v476_v23, 2  ;;  %v483_v35 = vadd.f32 %v482_v2, %v481_v51  ;;  %v495_v55 = vsel %vm375_vm0, %v351_v56, 0.0  ;;  %v502_v31 = vsel %vm375_vm0, %v1846_v48, 0.0 }
  0x84   : > { %2794 = vst [vmem:[#allocation19_spill] sm:$0xff] %v1983_v41  ;;  %v1991_v63 = vadd.f32 %v465_v50, %v464_v0  ;;  %v472_v33 = vrot.slane %v471_v44, 1  ;;  %v490_v45 = vadd.f32 %v489_v28, %v488_v29  ;;  %v496_v34 = vrot.slane %v495_v55, 4 }
  0x85   : > { %v478_v4 = vadd.f32 %v477_v46, %v476_v23  ;;  %v484_v40 = vrot.slane %v483_v35, 2  ;;  %v503_v7 = vrot.slane %v502_v31, 4  ;;  %v509_v36 = vsel %vm375_vm0, %v352_v57, 0.0 }
  0x86   : > { %2795 = vst [vmem:[#allocation20_spill] sm:$0xff] %v1991_v63  ;;  %v1997_v12 = vadd.f32 %v472_v33, %v471_v44  ;;  %v491_v47 = vrot.slane %v490_v45, 2  ;;  %v497_v56 = vadd.f32 %v496_v34, %v495_v55  ;;  %v510_v42 = vrot.slane %v509_v36, 4 }
  0x87   : > { %v479_v51 = vrot.slane %v478_v4, 1  ;;  %v485_v11 = vadd.f32 %v484_v40, %v483_v35  ;;  %v504_v0 = vadd.f32 %v503_v7, %v502_v31  ;;  %v516_v13 = vsel %vm375_vm0, %v1855_v52, 0.0 }
  0x88   : > { %2796 = vst [vmem:[#allocation21_spill] sm:$0xff] %v1997_v12  ;;  %v492_v2 = vadd.f32 %v491_v47, %v490_v45  ;;  %v498_v23 = vrot.slane %v497_v56, 2  ;;  %v511_v29 = vadd.f32 %v510_v42, %v509_v36  ;;  %v517_v50 = vrot.slane %v516_v13, 4 }
  0x89   : > { %v2001_v28 = vadd.f32 %v479_v51, %v478_v4  ;;  %v486_v48 = vrot.slane %v485_v11, 1  ;;  %v505_v46 = vrot.slane %v504_v0, 2  ;;  %v523_v57 = vsel %vm375_vm0, %v353_v61, 0.0 }
  0x8a   : > { %v493_v44 = vrot.slane %v492_v2, 1  ;;  %v499_v55 = vadd.f32 %v498_v23, %v497_v56  ;;  %v512_v35 = vrot.slane %v511_v29, 2  ;;  %v518_v31 = vadd.f32 %v517_v50, %v516_v13 }
  0x8b   : > { %2797 = vst [vmem:[#allocation22_spill] sm:$0xff] %v2001_v28  ;;  %v2007_v33 = vadd.f32 %v486_v48, %v485_v11  ;;  %v506_v34 = vadd.f32 %v505_v46, %v504_v0  ;;  %v524_v45 = vrot.slane %v523_v57, 4  ;;  %v530_v40 = vsel %vm375_vm0, %v1858_v53, 0.0 }
  0x8c   : > { %v2011_v4 = vadd.f32 %v493_v44, %v492_v2  ;;  %v500_v7 = vrot.slane %v499_v55, 1  ;;  %v513_v36 = vadd.f32 %v512_v35, %v511_v29  ;;  %v519_v47 = vrot.slane %v518_v31, 2 }
  0x8d   : > { %2798 = vst [vmem:[#allocation23_spill] sm:$0xff] %v2007_v33  ;;  %v507_v42 = vrot.slane %v506_v34, 1  ;;  %v525_v52 = vadd.f32 %v524_v45, %v523_v57  ;;  %v531_v51 = vrot.slane %v530_v40, 4  ;;  %v537_v61 = vsel %vm375_vm0, %v354_v62, 0.0  ;;  %v2115_v33 = vld [vmem:[%s1795_s6 + $0xf8] sm:$0xff] }
  0x8e   : > { %2799 = vst [vmem:[#allocation24_spill] sm:$0xff] %v2011_v4  ;;  %v2017_v56 = vadd.f32 %v500_v7, %v499_v55  ;;  %v514_v11 = vrot.slane %v513_v36, 1  ;;  %v520_v0 = vadd.f32 %v519_v47, %v518_v31  ;;  %v538_v13 = vrot.slane %v537_v61, 4 }
  0x8f   : > { %v2019_v23 = vadd.f32 %v507_v42, %v506_v34  ;;  %v526_v2 = vrot.slane %v525_v52, 2  ;;  %v532_v50 = vadd.f32 %v531_v51, %v530_v40  ;;  %v544_v29 = vsel %vm375_vm0, %v1861_v54, 0.0 }
  0x90   : > { %2800 = vst [vmem:[#allocation25_spill] sm:$0xff] %v2017_v56  ;;  %v2023_v48 = vadd.f32 %v514_v11, %v513_v36  ;;  %v521_v46 = vrot.slane %v520_v0, 1  ;;  %v539_v57 = vadd.f32 %v538_v13, %v537_v61  ;;  %v545_v44 = vrot.slane %v544_v29, 4  ;;  %v2108_v56 = vld [vmem:[%s1795_s6 + $0xf0] sm:$0xff] }
  0x91   : > { %2801 = vst [vmem:[#allocation26_spill] sm:$0xff] %v2019_v23  ;;  %v527_v53 = vadd.f32 %v526_v2, %v525_v52  ;;  %v533_v35 = vrot.slane %v532_v50, 2  ;;  %v2803_v62 = vcombine.high %v1861_v54, %v1861_v54  ;;  %v558_v31 = vsel %vm375_vm0, %v1870_v58, 0.0  ;;  %v2105_v23 = vld [vmem:[%s1795_s6 + $0xe8] sm:$0xff] }
  0x92   : > { %2802 = vst [vmem:[#allocation27_spill] sm:$0xff] %v2023_v48  ;;  %v2031_v34 = vadd.f32 %v521_v46, %v520_v0  ;;  %v540_v45 = vrot.slane %v539_v57, 2  ;;  %v546_v40 = vadd.f32 %v545_v44, %v544_v29  ;;  %v559_v42 = vrot.slane %v558_v31, 4 }
  0x93   : > { %v551_v55 = vsel %vm375_vm0, %v2803_v62, 0.0  ;;  %v528_v36 = vrot.slane %v527_v53, 1  ;;  %v534_v47 = vadd.f32 %v533_v35, %v532_v50  ;;  %v2805_v52 = vcombine.high %v1870_v58, %v1870_v58 }
  0x94   : > { %2804 = vst [vmem:[#allocation28_spill] sm:$0xff] %v2031_v34  ;;  %v552_v7 = vrot.slane %v551_v55, 4  ;;  %v541_v61 = vadd.f32 %v540_v45, %v539_v57  ;;  %v547_v54 = vrot.slane %v546_v40, 2  ;;  %v560_v0 = vadd.f32 %v559_v42, %v558_v31 }
  0x95   : > { %v565_v51 = vsel %vm375_vm0, %v2805_v52, 0.0  ;;  %v2037_v2 = vadd.f32 %v528_v36, %v527_v53  ;;  %v535_v62 = vrot.slane %v534_v47, 1  ;;  %v572_v29 = vsel %vm375_vm0, %v1873_v59, 0.0 }
  0x96   : > { %v553_v11 = vadd.f32 %v552_v7, %v551_v55  ;;  %v566_v13 = vrot.slane %v565_v51, 4  ;;  %v542_v46 = vrot.slane %v541_v61, 1  ;;  %v548_v44 = vadd.f32 %v547_v54, %v546_v40 }
  0x97   : > { %2806 = vst [vmem:[#allocation29_spill] sm:$0xff] %v2037_v2  ;;  %v2041_v34 = vadd.f32 %v535_v62, %v534_v47  ;;  %v561_v58 = vrot.slane %v560_v0, 2  ;;  %v573_v52 = vrot.slane %v572_v29, 4  ;;  %v2808_v57 = vcombine.high %v1873_v59, %v1873_v59 }
  0x98   : > { %v554_v50 = vrot.slane %v553_v11, 2  ;;  %v567_v35 = vadd.f32 %v566_v13, %v565_v51  ;;  %v2047_v55 = vadd.f32 %v542_v46, %v541_v61  ;;  %v549_v31 = vrot.slane %v548_v44, 1  ;;  %v1325_v61 = vld [vmem:[%s1795_s6 + $0x80] sm:$0xff] }
  0x99   : > { %2807 = vst [vmem:[#allocation30_spill] sm:$0xff] %v2041_v34  ;;  %v579_v53 = vsel %vm375_vm0, %v2808_v57, 0.0  ;;  %v562_v36 = vadd.f32 %v561_v58, %v560_v0  ;;  %v574_v40 = vadd.f32 %v573_v52, %v572_v29  ;;  %v586_v47 = vsel %vm375_vm0, %v1876_v60, 0.0  ;;  %v1327_v57 = vld [vmem:[%s1795_s6 + $0x90] sm:$0xff]  ;;  %v2096_v34 = vld [vmem:[%s1795_s6 + $0xe0] sm:$0xff] }
  0x9a   : > { %2809 = vst [vmem:[#allocation31_spill] sm:$0xff] %v2047_v55  ;;  %v555_v45 = vadd.f32 %v554_v50, %v553_v11  ;;  %v568_v7 = vrot.slane %v567_v35, 2  ;;  %v580_v42 = vrot.slane %v579_v53, 4  ;;  %v2051_v51 = vadd.f32 %v549_v31, %v548_v44  ;;  %v1326_v50 = vld [vmem:[%s1795_s6 + $0x88] sm:$0xff]  ;;  %v2063_v31 = vld [vmem:[%s1795_s6 + $0x98] sm:$0xff] }
  0x9b   : > { %v587_v13 = vrot.slane %v586_v47, 4  ;;  %v563_v62 = vrot.slane %v562_v36, 1  ;;  %v575_v46 = vrot.slane %v574_v40, 2  ;;  %v2811_v0 = vcombine.high %v1876_v60, %v1876_v60  ;;  %v2068_v60 = vld [vmem:[%s1795_s6 + $0xa0] sm:$0xff] }
  0x9c   : > { %2810 = vst [vmem:[#allocation32_spill] sm:$0xff] %v2051_v51  ;;  %v556_v54 = vrot.slane %v555_v45, 1  ;;  %v569_v59 = vadd.f32 %v568_v7, %v567_v35  ;;  %v581_v11 = vadd.f32 %v580_v42, %v579_v53  ;;  %v2079_v51 = vld [vmem:[%s1795_s6 + $0xb8] sm:$0xff]  ;;  %v635_v55 = vcombine.high %v1327_v57, %v1327_v57 }
  0x9d   : > { %v593_v29 = vsel %vm375_vm0, %v2811_v0, 0.0  ;;  %v588_v52 = vadd.f32 %v587_v13, %v586_v47  ;;  %v2065_v7 = vadd.f32 %v563_v62, %v562_v36  ;;  %v576_v53 = vadd.f32 %v575_v46, %v574_v40  ;;  %v2071_v0 = vld [vmem:[%s1795_s6 + $0xa8] sm:$0xff]  ;;  %v2082_v46 = vld [vmem:[%s1795_s6 + $0xc0] sm:$0xff] }
  0x9e   : > { %v2059_v58 = vadd.f32 %v556_v54, %v555_v45  ;;  %v570_v44 = vrot.slane %v569_v59, 1  ;;  %v594_v35 = vrot.slane %v593_v29, 4  ;;  %v582_v42 = vrot.slane %v581_v11, 2 }
  0x9f   : > { %2813 = vst [vmem:[#allocation34_spill] sm:$0xff] %v2065_v7  ;;  %v633_v45 = vcombine.high %v1325_v61, %v1325_v61  ;;  %v589_v47 = vrot.slane %v588_v52, 2  ;;  %v634_v36 = vcombine.high %v1326_v50, %v1326_v50  ;;  %v577_v40 = vrot.slane %v576_v53, 1  ;;  %v2085_v7 = vld [vmem:[%s1795_s6 + $0xc8] sm:$0xff] }
  0xa0   : > { %2812 = vst [vmem:[#allocation33_spill] sm:$0xff] %v2059_v58  ;;  %v2073_v54 = vadd.f32 %v570_v44, %v569_v59  ;;  %v595_v13 = vadd.f32 %v594_v35, %v593_v29  ;;  %v2076_v58 = vld [vmem:[%s1795_s6 + $0xb0] sm:$0xff]  ;;  %v583_v62 = vadd.f32 %v582_v42, %v581_v11  ;;  %v636_v59 = vcombine.high %v2063_v31, %v2063_v31 }
  0xa1   : > { %v590_v44 = vadd.f32 %v589_v47, %v588_v52  ;;  %v2090_v35 = vld [vmem:[%s1795_s6 + $0xd0] sm:$0xff]  ;;  %v2102_v2 = vadd.f32 %v577_v40, %v576_v53  ;;  %v672_v11 = vsel %vm375_vm0, %v633_v45, 0.0  ;;  %v679_v52 = vsel %vm375_vm0, %v1326_v50, 0.0 }
  0xa2   : > { %2814 = vst [vmem:[#allocation35_spill] sm:$0xff] %v2073_v54  ;;  %v596_v29 = vrot.slane %v595_v13, 2  ;;  %v2093_v54 = vld [vmem:[%s1795_s6 + $0xd8] sm:$0xff]  ;;  %v584_v48 = vrot.slane %v583_v62, 1  ;;  %v680_v47 = vrot.slane %v679_v52, 4  ;;  %v693_v42 = vsel %vm375_vm0, %v1327_v57, 0.0 }
  0xa3   : > { %2815 = vst [vmem:[#allocation36_spill] sm:$0xff] %v2102_v2  ;;  %v591_v4 = vrot.slane %v590_v44, 1  ;;  %v700_v53 = vsel %vm375_vm0, %v635_v55, 0.0  ;;  %v694_v28 = vrot.slane %v693_v42, 4 }
  0xa4   : > { %v597_v5 = vadd.f32 %v596_v29, %v595_v13  ;;  %v2121_v40 = vadd.f32 %v584_v48, %v583_v62  ;;  %v665_v62 = vsel %vm375_vm0, %v1325_v61, 0.0  ;;  %v707_v48 = vsel %vm375_vm0, %v2063_v31, 0.0 }
  0xa5   : > { %v2129_v13 = vadd.f32 %v591_v4, %v590_v44  ;;  %v666_v4 = vrot.slane %v665_v62, 4  ;;  %v673_v44 = vrot.slane %v672_v11, 4  ;;  %v681_v43 = vadd.f32 %v680_v47, %v679_v52 }
  0xa6   : > { %2816 = vst [vmem:[#allocation37_spill] sm:$0xff] %v2121_v40  ;;  %v598_v29 = vrot.slane %v597_v5, 1  ;;  %v701_v50 = vrot.slane %v700_v53, 4  ;;  %v695_v25 = vadd.f32 %v694_v28, %v693_v42 }
  0xa7   : > { %2817 = vst [vmem:[#allocation38_spill] sm:$0xff] %v2129_v13  ;;  %v686_v13 = vsel %vm375_vm0, %v634_v36, 0.0  ;;  %v667_v2 = vadd.f32 %v666_v4, %v665_v62  ;;  %v674_v61 = vadd.f32 %v673_v44, %v672_v11  ;;  %v682_v12 = vrot.slane %v681_v43, 2 }
  0xa8   : > { %v2140_v40 = vadd.f32 %v598_v29, %v597_v5  ;;  %v687_v45 = vrot.slane %v686_v13, 4  ;;  %v708_v5 = vrot.slane %v707_v48, 4  ;;  %v714_v29 = vsel %vm375_vm0, %v636_v59, 0.0 }
  0xa9   : > { %v675_v32 = vrot.slane %v674_v61, 2  ;;  %v702_v57 = vadd.f32 %v701_v50, %v700_v53  ;;  %v715_v55 = vrot.slane %v714_v29, 4  ;;  %v683_v31 = vadd.f32 %v682_v12, %v681_v43 }
  0xaa   : > { %2818 = vst [vmem:[#allocation39_spill] sm:$0xff] %v2140_v40  ;;  %v668_v40 = vrot.slane %v667_v2, 2  ;;  %v688_v36 = vadd.f32 %v687_v45, %v686_v13  ;;  %v709_v63 = vadd.f32 %v708_v5, %v707_v48  ;;  %v696_v11 = vrot.slane %v695_v25, 2 }
  0xab   : > { %v676_v41 = vadd.f32 %v675_v32, %v674_v61  ;;  %v703_v52 = vrot.slane %v702_v57, 2  ;;  %v716_v4 = vadd.f32 %v715_v55, %v714_v29  ;;  %v684_v20 = vrot.slane %v683_v31, 1 }
  0xac   : > { %v669_v21 = vadd.f32 %v668_v40, %v667_v2  ;;  %v689_v62 = vrot.slane %v688_v36, 2  ;;  %v710_v47 = vrot.slane %v709_v63, 2  ;;  %v697_v8 = vadd.f32 %v696_v11, %v695_v25 }
  0xad   : > { %v677_v15 = vrot.slane %v676_v41, 1  ;;  %v704_v1 = vadd.f32 %v703_v52, %v702_v57  ;;  %v717_v13 = vrot.slane %v716_v4, 2  ;;  %v2152_v2 = vadd.f32 %v684_v20, %v683_v31 }
  0xae   : > { %v670_v44 = vrot.slane %v669_v21, 1  ;;  %v690_v59 = vadd.f32 %v689_v62, %v688_v36  ;;  %v711_v3 = vadd.f32 %v710_v47, %v709_v63  ;;  %v698_v43 = vrot.slane %v697_v8, 1 }
  0xaf   : > { %v2150_v42 = vadd.f32 %v677_v15, %v676_v41  ;;  %v705_v12 = vrot.slane %v704_v1, 1  ;;  %v718_v40 = vadd.f32 %v717_v13, %v716_v4  ;;  %v721_v61 = vsel %vm375_vm0, %v2068_v60, 0.0 }
  0xb0   : > { %v2148_v28 = vadd.f32 %v670_v44, %v669_v21  ;;  %v691_v32 = vrot.slane %v690_v59, 1  ;;  %v712_v53 = vrot.slane %v711_v3, 1  ;;  %v2819_v25 = vcombine.high %v2068_v60, %v2068_v60 }
  0xb1   : > { %v735_v15 = vsel %vm375_vm0, %v2071_v0, 0.0  ;;  %v2164_v20 = vadd.f32 %v698_v43, %v697_v8  ;;  %v2166_v41 = vadd.f32 %v705_v12, %v704_v1  ;;  %v719_v45 = vrot.slane %v718_v40, 1 }
  0xb2   : > { %v2154_v48 = vadd.f32 %v691_v32, %v690_v59  ;;  %v728_v21 = vsel %vm375_vm0, %v2819_v25, 0.0  ;;  %v2168_v63 = vadd.f32 %v712_v53, %v711_v3  ;;  %v722_v50 = vrot.slane %v721_v61, 4 }
  0xb3   : > { %v729_v5 = vrot.slane %v728_v21, 4  ;;  %v736_v29 = vrot.slane %v735_v15, 4  ;;  %v2821_v36 = vcombine.high %v2071_v0, %v2071_v0  ;;  %v2174_v57 = vadd.f32 %v719_v45, %v718_v40 }
  0xb4   : > { %2820 = vst [vmem:[#allocation40_spill] sm:$0xff] %v2168_v63  ;;  %v749_v8 = vsel %vm375_vm0, %v2076_v58, 0.0  ;;  %v2823_v1 = vcombine.high %v2076_v58, %v2076_v58  ;;  %v723_v31 = vadd.f32 %v722_v50, %v721_v61  ;;  %v763_v0 = vsel %vm375_vm0, %v2079_v51, 0.0 }
  0xb5   : > { %v742_v60 = vsel %vm375_vm0, %v2821_v36, 0.0  ;;  %2822 = vst [vmem:[#allocation41_spill] sm:$0xff] %v2174_v57  ;;  %v730_v62 = vadd.f32 %v729_v5, %v728_v21  ;;  %v737_v11 = vadd.f32 %v736_v29, %v735_v15  ;;  %v750_v52 = vrot.slane %v749_v8, 4 }
  0xb6   : > { %v743_v55 = vrot.slane %v742_v60, 4  ;;  %v756_v3 = vsel %vm375_vm0, %v2823_v1, 0.0  ;;  %v2824_v44 = vcombine.high %v2079_v51, %v2079_v51  ;;  %v724_v13 = vrot.slane %v723_v31, 2 }
  0xb7   : > { %v757_v4 = vrot.slane %v756_v3, 4  ;;  %v731_v32 = vrot.slane %v730_v62, 2  ;;  %v738_v43 = vrot.slane %v737_v11, 2  ;;  %v751_v58 = vadd.f32 %v750_v52, %v749_v8 }
  0xb8   : > { %v744_v47 = vadd.f32 %v743_v55, %v742_v60  ;;  %v770_v59 = vsel %vm375_vm0, %v2824_v44, 0.0  ;;  %v764_v40 = vrot.slane %v763_v0, 4  ;;  %v725_v25 = vadd.f32 %v724_v13, %v723_v31 }
  0xb9   : > { %v758_v53 = vadd.f32 %v757_v4, %v756_v3  ;;  %v771_v61 = vrot.slane %v770_v59, 4  ;;  %v732_v21 = vadd.f32 %v731_v32, %v730_v62  ;;  %v739_v15 = vadd.f32 %v738_v43, %v737_v11 }
  0xba   : > { %v745_v12 = vrot.slane %v744_v47, 2  ;;  %v752_v45 = vrot.slane %v751_v58, 2  ;;  %v765_v29 = vadd.f32 %v764_v40, %v763_v0  ;;  %v726_v60 = vrot.slane %v725_v25, 1 }
  0xbb   : > { %v759_v5 = vrot.slane %v758_v53, 2  ;;  %v772_v36 = vadd.f32 %v771_v61, %v770_v59  ;;  %v733_v51 = vrot.slane %v732_v21, 1  ;;  %v740_v55 = vrot.slane %v739_v15, 1 }
  0xbc   : > { %v746_v50 = vadd.f32 %v745_v12, %v744_v47  ;;  %v753_v1 = vadd.f32 %v752_v45, %v751_v58  ;;  %v766_v63 = vrot.slane %v765_v29, 2  ;;  %v2188_v52 = vadd.f32 %v726_v60, %v725_v25 }
  0xbd   : > { %v760_v57 = vadd.f32 %v759_v5, %v758_v53  ;;  %v773_v8 = vrot.slane %v772_v36, 2  ;;  %v2190_v3 = vadd.f32 %v733_v51, %v732_v21  ;;  %v2192_v31 = vadd.f32 %v740_v55, %v739_v15 }
  0xbe   : > { %v747_v44 = vrot.slane %v746_v50, 1  ;;  %v754_v62 = vrot.slane %v753_v1, 1  ;;  %v767_v4 = vadd.f32 %v766_v63, %v765_v29  ;;  %v777_v13 = vsel %vm375_vm0, %v2082_v46, 0.0 }
  0xbf   : > { %v761_v47 = vrot.slane %v760_v57, 1  ;;  %v774_v0 = vadd.f32 %v773_v8, %v772_v36  ;;  %v2825_v32 = vcombine.high %v2082_v46, %v2082_v46  ;;  %v791_v58 = vsel %vm375_vm0, %v2085_v7, 0.0 }
  0xc0   : > { %v2194_v11 = vadd.f32 %v747_v44, %v746_v50  ;;  %v2196_v59 = vadd.f32 %v754_v62, %v753_v1  ;;  %v768_v53 = vrot.slane %v767_v4, 1  ;;  %v778_v61 = vrot.slane %v777_v13, 4 }
  0xc1   : > { %v784_v43 = vsel %vm375_vm0, %v2825_v32, 0.0  ;;  %v2206_v12 = vadd.f32 %v761_v47, %v760_v57  ;;  %v775_v40 = vrot.slane %v774_v0, 1  ;;  %v792_v25 = vrot.slane %v791_v58, 4 }
  0xc2   : > { %v785_v63 = vrot.slane %v784_v43, 4  ;;  %v2826_v21 = vcombine.high %v2085_v7, %v2085_v7  ;;  %v805_v46 = vsel %vm375_vm0, %v2090_v35, 0.0  ;;  %v2214_v45 = vadd.f32 %v768_v53, %v767_v4 }
  0xc3   : > { %v2216_v50 = vadd.f32 %v775_v40, %v774_v0  ;;  %v779_v5 = vadd.f32 %v778_v61, %v777_v13  ;;  %v793_v36 = vadd.f32 %v792_v25, %v791_v58  ;;  %v806_v60 = vrot.slane %v805_v46, 4 }
  0xc4   : > { %v798_v15 = vsel %vm375_vm0, %v2826_v21, 0.0  ;;  %v786_v29 = vadd.f32 %v785_v63, %v784_v43  ;;  %v2828_v51 = vcombine.high %v2090_v35, %v2090_v35  ;;  %v819_v8 = vsel %vm375_vm0, %v2093_v54, 0.0 }
  0xc5   : > { %2827 = vst [vmem:[#allocation42_spill] sm:$0xff] %v2216_v50  ;;  %v799_v57 = vrot.slane %v798_v15, 4  ;;  %v780_v7 = vrot.slane %v779_v5, 2  ;;  %v794_v47 = vrot.slane %v793_v36, 2  ;;  %v807_v4 = vadd.f32 %v806_v60, %v805_v46 }
  0xc6   : > { %v812_v55 = vsel %vm375_vm0, %v2828_v51, 0.0  ;;  %v787_v62 = vrot.slane %v786_v29, 2  ;;  %v820_v0 = vrot.slane %v819_v8, 4  ;;  %v2829_v58 = vcombine.high %v2093_v54, %v2093_v54 }
  0xc7   : > { %v800_v1 = vadd.f32 %v799_v57, %v798_v15  ;;  %v813_v44 = vrot.slane %v812_v55, 4  ;;  %v781_v13 = vadd.f32 %v780_v7, %v779_v5  ;;  %v795_v40 = vadd.f32 %v794_v47, %v793_v36 }
  0xc8   : > { %v826_v35 = vsel %vm375_vm0, %v2829_v58, 0.0  ;;  %v788_v53 = vadd.f32 %v787_v62, %v786_v29  ;;  %v808_v61 = vrot.slane %v807_v4, 2  ;;  %v821_v63 = vadd.f32 %v820_v0, %v819_v8 }
  0xc9   : > { %v801_v32 = vrot.slane %v800_v1, 2  ;;  %v814_v43 = vadd.f32 %v813_v44, %v812_v55  ;;  %v782_v25 = vrot.slane %v781_v13, 1  ;;  %v827_v57 = vrot.slane %v826_v35, 4 }
  0xca   : > { %v789_v51 = vrot.slane %v788_v53, 1  ;;  %v796_v50 = vrot.slane %v795_v40, 1  ;;  %v809_v46 = vadd.f32 %v808_v61, %v807_v4  ;;  %v822_v60 = vrot.slane %v821_v63, 2 }
  0xcb   : > { %v802_v21 = vadd.f32 %v801_v32, %v800_v1  ;;  %v815_v15 = vrot.slane %v814_v43, 2  ;;  %v2228_v5 = vadd.f32 %v782_v25, %v781_v13  ;;  %v828_v44 = vadd.f32 %v827_v57, %v826_v35 }
  0xcc   : > { %v2230_v54 = vadd.f32 %v789_v51, %v788_v53  ;;  %v2232_v58 = vadd.f32 %v796_v50, %v795_v40  ;;  %v810_v29 = vrot.slane %v809_v46, 1  ;;  %v823_v36 = vadd.f32 %v822_v60, %v821_v63 }
  0xcd   : > { %v803_v55 = vrot.slane %v802_v21, 1  ;;  %v816_v7 = vadd.f32 %v815_v15, %v814_v43  ;;  %v829_v62 = vrot.slane %v828_v44, 2  ;;  %v833_v47 = vsel %vm375_vm0, %v2096_v34, 0.0 }
  0xce   : > { %v2238_v4 = vadd.f32 %v810_v29, %v809_v46  ;;  %v824_v0 = vrot.slane %v823_v36, 1  ;;  %v834_v13 = vrot.slane %v833_v47, 4  ;;  %v2830_v32 = vcombine.high %v2096_v34, %v2096_v34 }
  0xcf   : > { %v2234_v8 = vadd.f32 %v803_v55, %v802_v21  ;;  %v817_v1 = vrot.slane %v816_v7, 1  ;;  %v830_v35 = vadd.f32 %v829_v62, %v828_v44  ;;  %v847_v40 = vsel %vm375_vm0, %v2105_v23, 0.0 }
  0xd0   : > { %v840_v43 = vsel %vm375_vm0, %v2830_v32, 0.0  ;;  %v2248_v61 = vadd.f32 %v824_v0, %v823_v36  ;;  %v835_v63 = vadd.f32 %v834_v13, %v833_v47  ;;  %v848_v25 = vrot.slane %v847_v40, 4 }
  0xd1   : > { %v2244_v50 = vadd.f32 %v817_v1, %v816_v7  ;;  %v841_v53 = vrot.slane %v840_v43, 4  ;;  %v2832_v21 = vcombine.high %v2105_v23, %v2105_v23  ;;  %v831_v57 = vrot.slane %v830_v35, 1 }
  0xd2   : > { %2831 = vst [vmem:[#allocation43_spill] sm:$0xff] %v2248_v61  ;;  %v861_v46 = vsel %vm375_vm0, %v2108_v56, 0.0  ;;  %v836_v60 = vrot.slane %v835_v63, 2  ;;  %v849_v55 = vadd.f32 %v848_v25, %v847_v40  ;;  %v2833_v44 = vcombine.high %v2108_v56, %v2108_v56 }
  0xd3   : > { %v854_v15 = vsel %vm375_vm0, %v2832_v21, 0.0  ;;  %v842_v34 = vadd.f32 %v841_v53, %v840_v43  ;;  %v862_v7 = vrot.slane %v861_v46, 4  ;;  %v2260_v36 = vadd.f32 %v831_v57, %v830_v35 }
  0xd4   : > { %v855_v51 = vrot.slane %v854_v15, 4  ;;  %v868_v29 = vsel %vm375_vm0, %v2833_v44, 0.0  ;;  %v837_v47 = vadd.f32 %v836_v60, %v835_v63  ;;  %v850_v0 = vrot.slane %v849_v55, 2 }
  0xd5   : > { %2834 = vst [vmem:[#allocation44_spill] sm:$0xff] %v2260_v36  ;;  %v843_v1 = vrot.slane %v842_v34, 2  ;;  %v869_v62 = vrot.slane %v868_v29, 4  ;;  %v863_v13 = vadd.f32 %v862_v7, %v861_v46  ;;  %v875_v32 = vsel %vm375_vm0, %v2115_v33, 0.0 }
  0xd6   : > { %v856_v23 = vadd.f32 %v855_v51, %v854_v15  ;;  %v876_v25 = vrot.slane %v875_v32, 4  ;;  %v838_v21 = vrot.slane %v837_v47, 1  ;;  %v851_v61 = vadd.f32 %v850_v0, %v849_v55 }
  0xd7   : > { %v844_v43 = vadd.f32 %v843_v1, %v842_v34  ;;  %v870_v40 = vadd.f32 %v869_v62, %v868_v29  ;;  %v864_v56 = vrot.slane %v863_v13, 2  ;;  %v2835_v35 = vcombine.high %v2115_v33, %v2115_v33 }
  0xd8   : > { %v857_v53 = vrot.slane %v856_v23, 2  ;;  %v877_v60 = vadd.f32 %v876_v25, %v875_v32  ;;  %v2268_v46 = vadd.f32 %v838_v21, %v837_v47  ;;  %v852_v7 = vrot.slane %v851_v61, 1 }
  0xd9   : > { %v882_v57 = vsel %vm375_vm0, %v2835_v35, 0.0  ;;  %v845_v15 = vrot.slane %v844_v43, 1  ;;  %v871_v63 = vrot.slane %v870_v40, 2  ;;  %v865_v44 = vadd.f32 %v864_v56, %v863_v13  ;;  %v2836_v56 = vld [vmem:[#allocation9_spill] sm:$0xff] }
  0xda   : > { %v858_v51 = vadd.f32 %v857_v53, %v856_v23  ;;  %v883_v34 = vrot.slane %v882_v57, 4  ;;  %v878_v55 = vrot.slane %v877_v60, 2  ;;  %v2272_v0 = vadd.f32 %v852_v7, %v851_v61 }
  0xdb   : > { %v2270_v1 = vadd.f32 %v845_v15, %v844_v43  ;;  %v872_v62 = vadd.f32 %v871_v63, %v870_v40  ;;  %v866_v36 = vrot.slane %v865_v44, 1  ;;  %v2276_v35 = vmul.f32 %v1893_v6, %v1923_v9 }
  0xdc   : > { %v859_v29 = vrot.slane %v858_v51, 1  ;;  %v884_v33 = vadd.f32 %v883_v34, %v882_v57  ;;  %v879_v32 = vadd.f32 %v878_v55, %v877_v60  ;;  %v2282_v13 = vmul.f32 %v1896_v10, %v1927_v16  ;;  %v2841_v60 = vld [vmem:[#allocation11_spill] sm:$0xff] }
  0xdd   : > { %v873_v47 = vrot.slane %v872_v62, 1  ;;  %v2284_v43 = vadd.f32 %v866_v36, %v865_v44  ;;  %v2288_v61 = vmul.f32 %v1899_v14, %v1929_v17  ;;  %v2292_v40 = vmul.f32 %v1901_v18, %v1933_v38  ;;  %v2844_v44 = vld [vmem:[#allocation12_spill] sm:$0xff] }
  0xde   : > { %v2278_v23 = vadd.f32 %v859_v29, %v858_v51  ;;  %v885_v53 = vrot.slane %v884_v33, 2  ;;  %v880_v25 = vrot.slane %v879_v32, 1  ;;  %v2298_v21 = vmul.f32 %v1904_v22, %v1939_v27  ;;  %v2837_v27 = vld [vmem:[#allocation17_spill] sm:$0xff]  ;;  %v2838_v51 = vld [vmem:[#allocation10_spill] sm:$0xff]  ;;  %v2846_v29 = vld [vmem:[#allocation20_spill] sm:$0xff] }
  0xdf   : > { %v2294_v9 = vadd.f32 %v873_v47, %v872_v62  ;;  %v2302_v16 = vmul.f32 %v1906_v26, %v1957_v49  ;;  %v2306_v17 = vmul.f32 %v1909_v30, %v1961_v24  ;;  %v2310_v38 = vmul.f32 %v1913_v37, %v1967_v39  ;;  %v2840_v49 = vld [vmem:[#allocation18_spill] sm:$0xff]  ;;  %v2843_v24 = vld [vmem:[#allocation19_spill] sm:$0xff]  ;;  %v2847_v62 = vld [vmem:[#allocation13_spill] sm:$0xff] }
  0xe0   : > { %v886_v36 = vadd.f32 %v885_v53, %v884_v33  ;;  %v2314_v57 = vmul.f32 %v2836_v56, %v1971_v19  ;;  %v2316_v15 = vadd.f32 %v880_v25, %v879_v32  ;;  %v2320_v63 = vmul.f32 %v2838_v51, %v2837_v27  ;;  %v2849_v19 = vld [vmem:[#allocation21_spill] sm:$0xff]  ;;  %v2850_v33 = vld [vmem:[#allocation14_spill] sm:$0xff]  ;;  %v2853_v53 = vld [vmem:[#allocation15_spill] sm:$0xff] }
  0xe1   : > { %v2324_v7 = vmul.f32 %v2841_v60, %v2840_v49  ;;  %v2328_v34 = vmul.f32 %v2844_v44, %v2843_v24  ;;  %v2332_v55 = vmul.f32 %v2847_v62, %v2846_v29  ;;  %v2336_v47 = vmul.f32 %v2850_v33, %v2849_v19  ;;  %v2852_v32 = vld [vmem:[#allocation22_spill] sm:$0xff]  ;;  %v2855_v27 = vld [vmem:[#allocation23_spill] sm:$0xff]  ;;  %v2856_v49 = vld [vmem:[#allocation16_spill] sm:$0xff] }
  0xe2   : > { %2839 = vst [vmem:[#allocation9_spill] sm:$0xff] %v2320_v63  ;;  %v887_v39 = vrot.slane %v886_v36, 1  ;;  %v2340_v25 = vmul.f32 %v2853_v53, %v2852_v32  ;;  %v2858_v24 = vld [vmem:[#allocation24_spill] sm:$0xff]  ;;  %v2860_v63 = vld [vmem:[#allocation25_spill] sm:$0xff]  ;;  %v2863_v32 = vld [vmem:[#allocation27_spill] sm:$0xff] }
  0xe3   : > { %2842 = vst [vmem:[#allocation17_spill] sm:$0xff] %v2324_v7  ;;  %2845 = vst [vmem:[#allocation10_spill] sm:$0xff] %v2328_v34  ;;  %v2345_v7 = vmul.f32 %v2856_v49, %v2855_v27  ;;  %v2349_v34 = vmul.f32 %v1893_v6, %v2858_v24  ;;  %v2353_v29 = vmul.f32 %v1896_v10, %v2860_v63  ;;  %v2865_v27 = vld [vmem:[#allocation28_spill] sm:$0xff]  ;;  %v2867_v24 = vld [vmem:[#allocation29_spill] sm:$0xff] }
  0xe4   : > { %2848 = vst [vmem:[#allocation18_spill] sm:$0xff] %v2332_v55  ;;  %2851 = vst [vmem:[#allocation11_spill] sm:$0xff] %v2336_v47  ;;  %v2862_v55 = vld [vmem:[#allocation26_spill] sm:$0xff]  ;;  %v2359_v47 = vadd.f32 %v887_v39, %v886_v36  ;;  %v2873_v39 = vld [vmem:[#allocation32_spill] sm:$0xff] }
  0xe5   : > { %2854 = vst [vmem:[#allocation19_spill] sm:$0xff] %v2340_v25  ;;  %2857 = vst [vmem:[#allocation12_spill] sm:$0xff] %v2345_v7  ;;  %v2357_v19 = vmul.f32 %v1899_v14, %v2862_v55  ;;  %v2363_v25 = vmul.f32 %v1901_v18, %v2863_v32  ;;  %v2367_v7 = vmul.f32 %v1904_v22, %v2865_v27  ;;  %v2869_v63 = vld [vmem:[#allocation30_spill] sm:$0xff]  ;;  %v2871_v55 = vld [vmem:[#allocation31_spill] sm:$0xff] }
  0xe6   : > { %2859 = vst [vmem:[#allocation20_spill] sm:$0xff] %v2349_v34  ;;  %2861 = vst [vmem:[#allocation13_spill] sm:$0xff] %v2353_v29  ;;  %v2371_v34 = vmul.f32 %v1906_v26, %v2867_v24  ;;  %v2375_v29 = vmul.f32 %v1909_v30, %v2869_v63  ;;  %v2379_v36 = vmul.f32 %v1913_v37, %v2871_v55 }
  0xe7   : > { %2864 = vst [vmem:[#allocation21_spill] sm:$0xff] %v2363_v25  ;;  %2866 = vst [vmem:[#allocation14_spill] sm:$0xff] %v2367_v7  ;;  %v2383_v32 = vmul.f32 %v2836_v56, %v2873_v39  ;;  %v2875_v25 = vld [vmem:[#allocation33_spill] sm:$0xff]  ;;  %v2877_v7 = vld [vmem:[#allocation34_spill] sm:$0xff] }
  0xe8   : > { %2868 = vst [vmem:[#allocation22_spill] sm:$0xff] %v2371_v34  ;;  %2870 = vst [vmem:[#allocation15_spill] sm:$0xff] %v2375_v29  ;;  %v2387_v27 = vmul.f32 %v2838_v51, %v2875_v25  ;;  %v2391_v24 = vmul.f32 %v2841_v60, %v2877_v7  ;;  %v2878_v34 = vld [vmem:[#allocation35_spill] sm:$0xff]  ;;  %v2880_v29 = vld [vmem:[#allocation36_spill] sm:$0xff] }
  0xe9   : > { %2872 = vst [vmem:[#allocation23_spill] sm:$0xff] %v2379_v36  ;;  %2874 = vst [vmem:[#allocation16_spill] sm:$0xff] %v2383_v32  ;;  %v2395_v63 = vmul.f32 %v2844_v44, %v2878_v34  ;;  %v2399_v55 = vmul.f32 %v2847_v62, %v2880_v29  ;;  %v2881_v36 = vld [vmem:[#allocation37_spill] sm:$0xff]  ;;  %v2883_v32 = vld [vmem:[#allocation38_spill] sm:$0xff]  ;;  %v921_v34 = vmul.f32 %v1893_v6, %v2148_v28 }
  0xea   : > { %2876 = vst [vmem:[#allocation24_spill] sm:$0xff] %v2387_v27  ;;  %v2403_v39 = vmul.f32 %v2850_v33, %v2881_v36  ;;  %v2407_v25 = vmul.f32 %v2853_v53, %v2883_v32  ;;  %v2885_v27 = vld [vmem:[#allocation39_spill] sm:$0xff]  ;;  %v923_v29 = vmul.f32 %v1899_v14, %v2152_v2  ;;  %v924_v36 = vmul.f32 %v1901_v18, %v2154_v48 }
  0xeb   : > { %2879 = vst [vmem:[#allocation25_spill] sm:$0xff] %v2395_v63  ;;  %v2411_v7 = vmul.f32 %v2856_v49, %v2885_v27  ;;  %v922_v63 = vmul.f32 %v1896_v10, %v2150_v42  ;;  %v925_v32 = vmul.f32 %v1904_v22, %v2164_v20  ;;  %v2887_v27 = vld [vmem:[#allocation40_spill] sm:$0xff]  ;;  %v929_v42 = vmul.f32 %v2836_v56, %v2188_v52 }
  0xec   : > { %2882 = vst [vmem:[#allocation26_spill] sm:$0xff] %v2403_v39  ;;  %2884 = vst [vmem:[#allocation27_spill] sm:$0xff] %v2407_v25  ;;  %v926_v25 = vmul.f32 %v1906_v26, %v2166_v41  ;;  %v2888_v39 = vld [vmem:[#allocation41_spill] sm:$0xff]  ;;  %v930_v2 = vmul.f32 %v2838_v51, %v2190_v3  ;;  %v931_v48 = vmul.f32 %v2841_v60, %v2192_v31  ;;  %v2889_v31 = vld [vmem:[#allocation42_spill] sm:$0xff] }
  0xed   : > { %2886 = vst [vmem:[#allocation28_spill] sm:$0xff] %v2411_v7  ;;  %v927_v7 = vmul.f32 %v1909_v30, %v2887_v27  ;;  %v928_v28 = vmul.f32 %v1913_v37, %v2888_v39  ;;  %1341 = vst [vmem:[%s2433_s8 + $0x100] sm:$0x3f] %v921_v34  ;;  %v932_v20 = vmul.f32 %v2844_v44, %v2194_v11 }
  0xee   : > { %1342 = vst [vmem:[%s2433_s8 + $0x108] sm:$0x3f] %v922_v63  ;;  %v933_v41 = vmul.f32 %v2847_v62, %v2196_v59  ;;  %v934_v52 = vmul.f32 %v2850_v33, %v2206_v12  ;;  %1343 = vst [vmem:[%s2433_s8 + $0x110] sm:$0x3f] %v923_v29  ;;  %v935_v3 = vmul.f32 %v2853_v53, %v2214_v45  ;;  %v2461_v63 = vpop.permute.xlu0 %956  ;;  %v2901_v29 = vld [vmem:[#allocation21_spill] sm:$0xff] }
  0xef   : > { %1344 = vst [vmem:[%s2433_s8 + $0x118] sm:$0x3f] %v924_v36  ;;  %1345 = vst [vmem:[%s2433_s8 + $0x120] sm:$0x3f] %v925_v32  ;;  %v936_v11 = vmul.f32 %v2856_v49, %v2889_v31  ;;  %v937_v59 = vmul.f32 %v1893_v6, %v2228_v5  ;;  %v938_v12 = vmul.f32 %v1896_v10, %v2230_v54  ;;  %v2890_v5 = vld [vmem:[#allocation43_spill] sm:$0xff]  ;;  %v2891_v54 = vld [vmem:[#allocation44_spill] sm:$0xff] }
  0xf0   : > { %1346 = vst [vmem:[%s2433_s8 + $0x128] sm:$0x3f] %v926_v25  ;;  %1347 = vst [vmem:[%s2433_s8 + $0x130] sm:$0x3f] %v927_v7  ;;  %v939_v45 = vmul.f32 %v1899_v14, %v2232_v58  ;;  %v940_v39 = vmul.f32 %v1901_v18, %v2234_v8  ;;  %v941_v6 = vmul.f32 %v1904_v22, %v2238_v4  ;;  %v2900_v25 = vld [vmem:[#allocation13_spill] sm:$0xff]  ;;  %v2902_v32 = vld [vmem:[#allocation14_spill] sm:$0xff] }
  0xf1   : > { %1348 = vst [vmem:[%s2433_s8 + $0x138] sm:$0x3f] %v928_v28  ;;  %1349 = vst [vmem:[%s2433_s8 + $0x140] sm:$0x3f] %v929_v42  ;;  %v942_v10 = vmul.f32 %v1906_v26, %v2244_v50  ;;  %v943_v14 = vmul.f32 %v1909_v30, %v2890_v5  ;;  %v944_v18 = vmul.f32 %v1913_v37, %v2891_v54  ;;  %v2903_v28 = vld [vmem:[#allocation22_spill] sm:$0xff] }
  0xf2   : > { %1350 = vst [vmem:[%s2433_s8 + $0x148] sm:$0x3f] %v930_v2  ;;  %1351 = vst [vmem:[%s2433_s8 + $0x150] sm:$0x3f] %v931_v48  ;;  %v945_v22 = vmul.f32 %v2836_v56, %v2268_v46  ;;  %v946_v26 = vmul.f32 %v2838_v51, %v2270_v1  ;;  %v947_v30 = vmul.f32 %v2841_v60, %v2272_v0  ;;  %v2894_v56 = vld [vmem:[#allocation10_spill] sm:$0xff]  ;;  %v2896_v51 = vld [vmem:[#allocation11_spill] sm:$0xff] }
  0xf3   : > { %1352 = vst [vmem:[%s2433_s8 + $0x158] sm:$0x3f] %v932_v20  ;;  %1353 = vst [vmem:[%s2433_s8 + $0x160] sm:$0x3f] %v933_v41  ;;  %v948_v37 = vmul.f32 %v2844_v44, %v2278_v23  ;;  %v949_v58 = vmul.f32 %v2847_v62, %v2284_v43  ;;  %v950_v8 = vmul.f32 %v2850_v33, %v2294_v9  ;;  %v2892_v9 = vld [vmem:[#allocation9_spill] sm:$0xff]  ;;  %v2897_v44 = vld [vmem:[#allocation19_spill] sm:$0xff] }
  0xf4   : > { %1354 = vst [vmem:[%s2433_s8 + $0x168] sm:$0x3f] %v934_v52  ;;  %1355 = vst [vmem:[%s2433_s8 + $0x170] sm:$0x3f] %v935_v3  ;;  %v951_v4 = vmul.f32 %v2853_v53, %v2316_v15  ;;  %v952_v50 = vmul.f32 %v2856_v49, %v2359_v47  ;;  %v959_v46 = vadd.f32 %v2461_v63, %v2276_v35  ;;  %v2895_v15 = vld [vmem:[#allocation18_spill] sm:$0xff]  ;;  %v2898_v33 = vld [vmem:[#allocation12_spill] sm:$0xff] }
  0xf5   : > { %1356 = vst [vmem:[%s2433_s8 + $0x178] sm:$0x3f] %v936_v11  ;;  %1357 = vst [vmem:[%s2433_s8 + $0x180] sm:$0x3f] %v937_v59  ;;  %v960_v1 = vadd.f32 %v2461_v63, %v2282_v13  ;;  %v961_v0 = vadd.f32 %v2461_v63, %v2288_v61  ;;  %v962_v23 = vadd.f32 %v2461_v63, %v2292_v40  ;;  %v2899_v53 = vld [vmem:[#allocation20_spill] sm:$0xff]  ;;  %v2904_v2 = vld [vmem:[#allocation15_spill] sm:$0xff] }
  0xf6   : > { %1358 = vst [vmem:[%s2433_s8 + $0x188] sm:$0x3f] %v938_v12  ;;  %1359 = vst [vmem:[%s2433_s8 + $0x190] sm:$0x3f] %v939_v45  ;;  %v963_v35 = vadd.f32 %v2461_v63, %v2298_v21  ;;  %v964_v13 = vadd.f32 %v2461_v63, %v2302_v16  ;;  %v965_v43 = vadd.f32 %v2461_v63, %v2306_v17  ;;  %v2893_v16 = vld [vmem:[#allocation17_spill] sm:$0xff]  ;;  %v2905_v48 = vld [vmem:[#allocation23_spill] sm:$0xff] }
  0xf7   : > { %1360 = vst [vmem:[%s2433_s8 + $0x198] sm:$0x3f] %v940_v39  ;;  %1361 = vst [vmem:[%s2433_s8 + $0x1a0] sm:$0x3f] %v941_v6  ;;  %v966_v61 = vadd.f32 %v2461_v63, %v2310_v38  ;;  %v967_v40 = vadd.f32 %v2461_v63, %v2314_v57  ;;  %v968_v21 = vadd.f32 %v2461_v63, %v2892_v9  ;;  %v2906_v41 = vld [vmem:[#allocation16_spill] sm:$0xff]  ;;  %v2908_v59 = vld [vmem:[#allocation25_spill] sm:$0xff] }
  0xf8   : > { %1362 = vst [vmem:[%s2433_s8 + $0x1a8] sm:$0x3f] %v942_v10  ;;  %1363 = vst [vmem:[%s2433_s8 + $0x1b0] sm:$0x3f] %v943_v14  ;;  %v969_v17 = vadd.f32 %v2461_v63, %v2893_v16  ;;  %v970_v38 = vadd.f32 %v2461_v63, %v2894_v56  ;;  %v971_v57 = vadd.f32 %v2461_v63, %v2895_v15  ;;  %v2907_v3 = vld [vmem:[#allocation24_spill] sm:$0xff]  ;;  %v2909_v39 = vld [vmem:[#allocation26_spill] sm:$0xff] }
  0xf9   : > { %1364 = vst [vmem:[%s2433_s8 + $0x1b8] sm:$0x3f] %v944_v18  ;;  %1365 = vst [vmem:[%s2433_s8 + $0x1c0] sm:$0x3f] %v945_v22  ;;  %v972_v60 = vadd.f32 %v2461_v63, %v2896_v51  ;;  %v973_v62 = vadd.f32 %v2461_v63, %v2897_v44  ;;  %v974_v47 = vadd.f32 %v2461_v63, %v2898_v33  ;;  %v2910_v10 = vld [vmem:[#allocation27_spill] sm:$0xff]  ;;  %v2911_v5 = vld [vmem:[#allocation28_spill] sm:$0xff] }
  0xfa   : > { %1366 = vst [vmem:[%s2433_s8 + $0x1c8] sm:$0x3f] %v946_v26  ;;  %1367 = vst [vmem:[%s2433_s8 + $0x1d0] sm:$0x3f] %v947_v30  ;;  %v975_v49 = vadd.f32 %v2461_v63, %v2899_v53  ;;  %v976_v7 = vadd.f32 %v2461_v63, %v2900_v25  ;;  %v977_v34 = vadd.f32 %v2461_v63, %v2357_v19  ;;  %v1147_v33 = vld [vmem:[%s2433_s8 + $0x108] sm:$0xff] (%p2912_p11)  ;;  %v1151_v53 = vld [vmem:[%s2433_s8 + $0x118] sm:$0xff] (%p2912_p11) }
  0xfb   : > { %1368 = vst [vmem:[%s2433_s8 + $0x1d8] sm:$0x3f] %v948_v37  ;;  %1369 = vst [vmem:[%s2433_s8 + $0x1e0] sm:$0x3f] %v949_v58  ;;  %v978_v36 = vadd.f32 %v2461_v63, %v2901_v29  ;;  %v979_v27 = vadd.f32 %v2461_v63, %v2902_v32  ;;  %v980_v42 = vadd.f32 %v2461_v63, %v2903_v28  ;;  %v1155_v25 = vld [vmem:[%s2433_s8 + $0x128] sm:$0xff] (%p2912_p11)  ;;  %v1161_v29 = vld [vmem:[%s2433_s8 + $0x140] sm:$0xff] (%p2912_p11) }
  0xfc   : > { %1370 = vst [vmem:[%s2433_s8 + $0x1e8] sm:$0x3f] %v950_v8  ;;  %991 = vst [vmem:[%s2433_s8] sm:$0x3f] %v959_v46  ;;  %v981_v19 = vadd.f32 %v2461_v63, %v2904_v2  ;;  %v982_v20 = vadd.f32 %v2461_v63, %v2905_v48  ;;  %v983_v52 = vadd.f32 %v2461_v63, %v2906_v41  ;;  %v1165_v32 = vld [vmem:[%s2433_s8 + $0x150] sm:$0xff] (%p2912_p11)  ;;  %v1169_v28 = vld [vmem:[%s2433_s8 + $0x160] sm:$0xff] (%p2912_p11) }
  0xfd   : > { %992 = vst [vmem:[%s2433_s8 + $0x8] sm:$0x3f] %v960_v1  ;;  %1371 = vst [vmem:[%s2433_s8 + $0x1f0] sm:$0x3f] %v951_v4  ;;  %v984_v31 = vadd.f32 %v2461_v63, %v2907_v3  ;;  %v985_v11 = vadd.f32 %v2461_v63, %v2391_v24  ;;  %v986_v12 = vadd.f32 %v2461_v63, %v2908_v59  ;;  %v1173_v2 = vld [vmem:[%s2433_s8 + $0x170] sm:$0xff] (%p2912_p11)  ;;  %v1177_v48 = vld [vmem:[%s2433_s8 + $0x180] sm:$0xff] (%p2912_p11) }
  0xfe   : > { %1372 = vst [vmem:[%s2433_s8 + $0x1f8] sm:$0x3f] %v952_v50  ;;  %993 = vst [vmem:[%s2433_s8 + $0x10] sm:$0x3f] %v961_v0  ;;  %v987_v45 = vadd.f32 %v2461_v63, %v2399_v55  ;;  %v988_v6 = vadd.f32 %v2461_v63, %v2909_v39  ;;  %v989_v24 = vadd.f32 %v2461_v63, %v2910_v10  ;;  %v1181_v41 = vld [vmem:[%s2433_s8 + $0x190] sm:$0xff] (%p2912_p11)  ;;  %v1185_v3 = vld [vmem:[%s2433_s8 + $0x1a0] sm:$0xff] (%p2912_p11) }
  0xff   : > { %994 = vst [vmem:[%s2433_s8 + $0x18] sm:$0x3f] %v962_v23  ;;  %995 = vst [vmem:[%s2433_s8 + $0x20] sm:$0x3f] %v963_v35  ;;  %v990_v14 = vadd.f32 %v2461_v63, %v2911_v5 }
 0x100   : > { %996 = vst [vmem:[%s2433_s8 + $0x28] sm:$0x3f] %v964_v13  ;;  %997 = vst [vmem:[%s2433_s8 + $0x30] sm:$0x3f] %v965_v43  ;;  %v1191_v59 = vld [vmem:[%s2433_s8 + $0x1b8] sm:$0xff] (%p2912_p11) }
 0x101   : > { %998 = vst [vmem:[%s2433_s8 + $0x38] sm:$0x3f] %v966_v61  ;;  %999 = vst [vmem:[%s2433_s8 + $0x40] sm:$0x3f] %v967_v40  ;;  %v1197_v39 = vld [vmem:[%s2433_s8 + $0x1d0] sm:$0xff] (%p2912_p11) }
 0x102   : > { %1000 = vst [vmem:[%s2433_s8 + $0x48] sm:$0x3f] %v968_v21  ;;  %1001 = vst [vmem:[%s2433_s8 + $0x50] sm:$0x3f] %v969_v17  ;;  %v1201_v10 = vld [vmem:[%s2433_s8 + $0x1e0] sm:$0xff] (%p2912_p11) }
 0x103   : > { %1002 = vst [vmem:[%s2433_s8 + $0x58] sm:$0x3f] %v970_v38  ;;  %1003 = vst [vmem:[%s2433_s8 + $0x60] sm:$0x3f] %v971_v57  ;;  %v1081_v55 = vld [vmem:[%s2433_s8] sm:$0xff] (%p2912_p11) }
 0x104   : > { %1004 = vst [vmem:[%s2433_s8 + $0x68] sm:$0x3f] %v972_v60  ;;  %1005 = vst [vmem:[%s2433_s8 + $0x70] sm:$0x3f] %v973_v62  ;;  %v1083_v63 = vld [vmem:[%s2433_s8 + $0x8] sm:$0xff] (%p2912_p11)  ;;  %v1145_v62 = vld [vmem:[%s2433_s8 + $0x100] sm:$0xff] (%p2912_p11) }
 0x105   : > { %1006 = vst [vmem:[%s2433_s8 + $0x78] sm:$0x3f] %v974_v47  ;;  %1007 = vst [vmem:[%s2433_s8 + $0x80] sm:$0x3f] %v975_v49  ;;  %v1085_v54 = vld [vmem:[%s2433_s8 + $0x10] sm:$0xff] (%p2912_p11)  ;;  %v1153_v49 = vld [vmem:[%s2433_s8 + $0x120] sm:$0xff] (%p2912_p11) }
 0x106   : > { %1008 = vst [vmem:[%s2433_s8 + $0x88] sm:$0x3f] %v976_v7  ;;  %1009 = vst [vmem:[%s2433_s8 + $0x90] sm:$0x3f] %v977_v34  ;;  %v1087_v18 = vld [vmem:[%s2433_s8 + $0x18] sm:$0xff] (%p2912_p11)  ;;  %v1089_v22 = vld [vmem:[%s2433_s8 + $0x20] sm:$0xff] (%p2912_p11) }
 0x107   : > { %1010 = vst [vmem:[%s2433_s8 + $0x98] sm:$0x3f] %v978_v36  ;;  %1011 = vst [vmem:[%s2433_s8 + $0xa0] sm:$0x3f] %v979_v27  ;;  %1062 = sbr.rel (!%p2912_p11) target bundleno = 302 (0x12e), region = 44  ;;  %v1091_v26 = vld [vmem:[%s2433_s8 + $0x28] sm:$0xff] (%p2912_p11) }
 0x108   : > { %1012 = vst [vmem:[%s2433_s8 + $0xa8] sm:$0x3f] %v980_v42  ;;  %1013 = vst [vmem:[%s2433_s8 + $0xb0] sm:$0x3f] %v981_v19  ;;  %v1093_v30 = vld [vmem:[%s2433_s8 + $0x30] sm:$0xff] (%p2912_p11)  ;;  %v1095_v37 = vld [vmem:[%s2433_s8 + $0x38] sm:$0xff] (%p2912_p11) }
 0x109   : > { %1014 = vst [vmem:[%s2433_s8 + $0xb8] sm:$0x3f] %v982_v20  ;;  %1015 = vst [vmem:[%s2433_s8 + $0xc0] sm:$0x3f] %v983_v52  ;;  %v1097_v58 = vld [vmem:[%s2433_s8 + $0x40] sm:$0xff] (%p2912_p11)  ;;  %v1099_v8 = vld [vmem:[%s2433_s8 + $0x48] sm:$0xff] (%p2912_p11) }
 0x10a   : > { %1016 = vst [vmem:[%s2433_s8 + $0xc8] sm:$0x3f] %v984_v31  ;;  %1017 = vst [vmem:[%s2433_s8 + $0xd0] sm:$0x3f] %v985_v11  ;;  %v1101_v4 = vld [vmem:[%s2433_s8 + $0x50] sm:$0xff] (%p2912_p11)  ;;  %v1103_v50 = vld [vmem:[%s2433_s8 + $0x58] sm:$0xff] (%p2912_p11) }
 0x10b   : > { %1018 = vst [vmem:[%s2433_s8 + $0xd8] sm:$0x3f] %v986_v12  ;;  %1019 = vst [vmem:[%s2433_s8 + $0xe0] sm:$0x3f] %v987_v45  ;;  %v1105_v46 = vld [vmem:[%s2433_s8 + $0x60] sm:$0xff] (%p2912_p11)  ;;  %v1107_v1 = vld [vmem:[%s2433_s8 + $0x68] sm:$0xff] (%p2912_p11) }
 0x10c   : > { %1020 = vst [vmem:[%s2433_s8 + $0xe8] sm:$0x3f] %v988_v6  ;;  %1021 = vst [vmem:[%s2433_s8 + $0xf0] sm:$0x3f] %v989_v24  ;;  %v1109_v0 = vld [vmem:[%s2433_s8 + $0x70] sm:$0xff] (%p2912_p11)  ;;  %v1111_v23 = vld [vmem:[%s2433_s8 + $0x78] sm:$0xff] (%p2912_p11) }
 0x10d   : > { %1022 = vst [vmem:[%s2433_s8 + $0xf8] sm:$0x3f] %v990_v14  ;;  %1082 = vst [vmem:[%s2618_s30] sm:$0xff] (%p2912_p11), %v1081_v55  ;;  %v1113_v35 = vld [vmem:[%s2433_s8 + $0x80] sm:$0xff] (%p2912_p11)  ;;  %v1115_v13 = vld [vmem:[%s2433_s8 + $0x88] sm:$0xff] (%p2912_p11) }
 0x10e   : > { %1084 = vst [vmem:[%s2618_s30 + $0x8] sm:$0xff] %v1083_v63  ;;  %1086 = vst [vmem:[%s2618_s30 + $0x10] sm:$0xff] %v1085_v54  ;;  %v1117_v43 = vld [vmem:[%s2433_s8 + $0x90] sm:$0xff]  ;;  %v1119_v61 = vld [vmem:[%s2433_s8 + $0x98] sm:$0xff] }
 0x10f   : > { %1088 = vst [vmem:[%s2618_s30 + $0x18] sm:$0xff] %v1087_v18  ;;  %1090 = vst [vmem:[%s2618_s30 + $0x20] sm:$0xff] %v1089_v22  ;;  %v1121_v40 = vld [vmem:[%s2433_s8 + $0xa0] sm:$0xff]  ;;  %v1123_v9 = vld [vmem:[%s2433_s8 + $0xa8] sm:$0xff] }
 0x110   : > { %1092 = vst [vmem:[%s2618_s30 + $0x28] sm:$0xff] %v1091_v26  ;;  %1094 = vst [vmem:[%s2618_s30 + $0x30] sm:$0xff] %v1093_v30  ;;  %v1125_v21 = vld [vmem:[%s2433_s8 + $0xb0] sm:$0xff]  ;;  %v1127_v16 = vld [vmem:[%s2433_s8 + $0xb8] sm:$0xff] }
 0x111   : > { %1096 = vst [vmem:[%s2618_s30 + $0x38] sm:$0xff] %v1095_v37  ;;  %1098 = vst [vmem:[%s2618_s30 + $0x40] sm:$0xff] %v1097_v58  ;;  %v1129_v17 = vld [vmem:[%s2433_s8 + $0xc0] sm:$0xff]  ;;  %v1131_v56 = vld [vmem:[%s2433_s8 + $0xc8] sm:$0xff] }
 0x112   : > { %1100 = vst [vmem:[%s2618_s30 + $0x48] sm:$0xff] %v1099_v8  ;;  %1102 = vst [vmem:[%s2618_s30 + $0x50] sm:$0xff] %v1101_v4  ;;  %v1133_v38 = vld [vmem:[%s2433_s8 + $0xd0] sm:$0xff]  ;;  %v1135_v15 = vld [vmem:[%s2433_s8 + $0xd8] sm:$0xff] }
 0x113   : > { %1104 = vst [vmem:[%s2618_s30 + $0x58] sm:$0xff] %v1103_v50  ;;  %1106 = vst [vmem:[%s2618_s30 + $0x60] sm:$0xff] %v1105_v46  ;;  %v1137_v57 = vld [vmem:[%s2433_s8 + $0xe0] sm:$0xff]  ;;  %v1139_v51 = vld [vmem:[%s2433_s8 + $0xe8] sm:$0xff] }
 0x114   : > { %1108 = vst [vmem:[%s2618_s30 + $0x68] sm:$0xff] %v1107_v1  ;;  %1110 = vst [vmem:[%s2618_s30 + $0x70] sm:$0xff] %v1109_v0  ;;  %v1141_v60 = vld [vmem:[%s2433_s8 + $0xf0] sm:$0xff]  ;;  %v1143_v44 = vld [vmem:[%s2433_s8 + $0xf8] sm:$0xff] }
 0x115   : > { %1112 = vst [vmem:[%s2618_s30 + $0x78] sm:$0xff] %v1111_v23  ;;  %1114 = vst [vmem:[%s2618_s30 + $0x100] sm:$0xff] %v1113_v35  ;;  %v1149_v47 = vld [vmem:[%s2433_s8 + $0x110] sm:$0xff]  ;;  %v1159_v34 = vld [vmem:[%s2433_s8 + $0x138] sm:$0xff] }
 0x116   : > { %1116 = vst [vmem:[%s2618_s30 + $0x108] sm:$0xff] %v1115_v13  ;;  %1118 = vst [vmem:[%s2618_s30 + $0x110] sm:$0xff] %v1117_v43  ;;  %v1157_v7 = vld [vmem:[%s2433_s8 + $0x130] sm:$0xff]  ;;  %v1163_v36 = vld [vmem:[%s2433_s8 + $0x148] sm:$0xff] }
 0x117   : > { %1120 = vst [vmem:[%s2618_s30 + $0x118] sm:$0xff] %v1119_v61  ;;  %1122 = vst [vmem:[%s2618_s30 + $0x120] sm:$0xff] %v1121_v40  ;;  %v1167_v27 = vld [vmem:[%s2433_s8 + $0x158] sm:$0xff]  ;;  %v1171_v42 = vld [vmem:[%s2433_s8 + $0x168] sm:$0xff] }
 0x118   : > { %1124 = vst [vmem:[%s2618_s30 + $0x128] sm:$0xff] %v1123_v9  ;;  %1126 = vst [vmem:[%s2618_s30 + $0x130] sm:$0xff] %v1125_v21  ;;  %v1175_v19 = vld [vmem:[%s2433_s8 + $0x178] sm:$0xff]  ;;  %v1179_v20 = vld [vmem:[%s2433_s8 + $0x188] sm:$0xff] }
 0x119   : > { %1128 = vst [vmem:[%s2618_s30 + $0x138] sm:$0xff] %v1127_v16  ;;  %1130 = vst [vmem:[%s2618_s30 + $0x140] sm:$0xff] %v1129_v17  ;;  %v1183_v52 = vld [vmem:[%s2433_s8 + $0x198] sm:$0xff]  ;;  %v1187_v31 = vld [vmem:[%s2433_s8 + $0x1a8] sm:$0xff] }
 0x11a   : > { %1132 = vst [vmem:[%s2618_s30 + $0x148] sm:$0xff] %v1131_v56  ;;  %1134 = vst [vmem:[%s2618_s30 + $0x150] sm:$0xff] %v1133_v38  ;;  %v1189_v11 = vld [vmem:[%s2433_s8 + $0x1b0] sm:$0xff]  ;;  %v1193_v12 = vld [vmem:[%s2433_s8 + $0x1c0] sm:$0xff] }
 0x11b   : > { %1136 = vst [vmem:[%s2618_s30 + $0x158] sm:$0xff] %v1135_v15  ;;  %1138 = vst [vmem:[%s2618_s30 + $0x160] sm:$0xff] %v1137_v57  ;;  %v1195_v45 = vld [vmem:[%s2433_s8 + $0x1c8] sm:$0xff]  ;;  %v1199_v6 = vld [vmem:[%s2433_s8 + $0x1d8] sm:$0xff] }
 0x11c   : > { %1140 = vst [vmem:[%s2618_s30 + $0x168] sm:$0xff] %v1139_v51  ;;  %1142 = vst [vmem:[%s2618_s30 + $0x170] sm:$0xff] %v1141_v60  ;;  %v1203_v24 = vld [vmem:[%s2433_s8 + $0x1e8] sm:$0xff]  ;;  %v1205_v5 = vld [vmem:[%s2433_s8 + $0x1f0] sm:$0xff] }
 0x11d   : > { %1144 = vst [vmem:[%s2618_s30 + $0x178] sm:$0xff] %v1143_v44  ;;  %1146 = vst [vmem:[%s2618_s30 + $0x200] sm:$0xff] %v1145_v62  ;;  %v1207_v14 = vld [vmem:[%s2433_s8 + $0x1f8] sm:$0xff] }
 0x11e   : > { %1148 = vst [vmem:[%s2618_s30 + $0x208] sm:$0xff] %v1147_v33  ;;  %1150 = vst [vmem:[%s2618_s30 + $0x210] sm:$0xff] %v1149_v47 }
 0x11f   : > { %1152 = vst [vmem:[%s2618_s30 + $0x218] sm:$0xff] %v1151_v53  ;;  %1154 = vst [vmem:[%s2618_s30 + $0x220] sm:$0xff] %v1153_v49 }
 0x120   : > { %1156 = vst [vmem:[%s2618_s30 + $0x228] sm:$0xff] %v1155_v25  ;;  %1158 = vst [vmem:[%s2618_s30 + $0x230] sm:$0xff] %v1157_v7 }
 0x121   : > { %1160 = vst [vmem:[%s2618_s30 + $0x238] sm:$0xff] %v1159_v34  ;;  %1162 = vst [vmem:[%s2618_s30 + $0x240] sm:$0xff] %v1161_v29 }
 0x122   : > { %1164 = vst [vmem:[%s2618_s30 + $0x248] sm:$0xff] %v1163_v36  ;;  %1166 = vst [vmem:[%s2618_s30 + $0x250] sm:$0xff] %v1165_v32 }
 0x123   : > { %1168 = vst [vmem:[%s2618_s30 + $0x258] sm:$0xff] %v1167_v27  ;;  %1170 = vst [vmem:[%s2618_s30 + $0x260] sm:$0xff] %v1169_v28 }
 0x124   : > { %1172 = vst [vmem:[%s2618_s30 + $0x268] sm:$0xff] %v1171_v42  ;;  %1174 = vst [vmem:[%s2618_s30 + $0x270] sm:$0xff] %v1173_v2 }
 0x125   : > { %1176 = vst [vmem:[%s2618_s30 + $0x278] sm:$0xff] %v1175_v19  ;;  %1178 = vst [vmem:[%s2618_s30 + $0x300] sm:$0xff] %v1177_v48 }
 0x126   : > { %1180 = vst [vmem:[%s2618_s30 + $0x308] sm:$0xff] %v1179_v20  ;;  %1182 = vst [vmem:[%s2618_s30 + $0x310] sm:$0xff] %v1181_v41 }
 0x127   : > { %1184 = vst [vmem:[%s2618_s30 + $0x318] sm:$0xff] %v1183_v52  ;;  %1186 = vst [vmem:[%s2618_s30 + $0x320] sm:$0xff] %v1185_v3 }
 0x128   : > { %1188 = vst [vmem:[%s2618_s30 + $0x328] sm:$0xff] %v1187_v31  ;;  %1190 = vst [vmem:[%s2618_s30 + $0x330] sm:$0xff] %v1189_v11 }
 0x129   : > { %1192 = vst [vmem:[%s2618_s30 + $0x338] sm:$0xff] %v1191_v59  ;;  %1194 = vst [vmem:[%s2618_s30 + $0x340] sm:$0xff] %v1193_v12 }
 0x12a   : > { %1196 = vst [vmem:[%s2618_s30 + $0x348] sm:$0xff] %v1195_v45  ;;  %1198 = vst [vmem:[%s2618_s30 + $0x350] sm:$0xff] %v1197_v39 }
 0x12b   : > { %1200 = vst [vmem:[%s2618_s30 + $0x358] sm:$0xff] %v1199_v6  ;;  %1202 = vst [vmem:[%s2618_s30 + $0x360] sm:$0xff] %v1201_v10 }
 0x12c   : > { %1204 = vst [vmem:[%s2618_s30 + $0x368] sm:$0xff] %v1203_v24  ;;  %1206 = vst [vmem:[%s2618_s30 + $0x370] sm:$0xff] %v1205_v5 }
 0x12d   : > { %1208 = vst [vmem:[%s2618_s30 + $0x378] sm:$0xff] %v1207_v14 }
 0x12e PF: > { %s19_s17 = sadd.s32 1, %s1624_s17   ;;  %s2913_s12 = smov %s1608_s13 }
 0x12f   : > { %p16_p0 = scmp.ge.s32.totalorder %s19_s17, 4   ;;  %s2914_s13 = smov %s1612_s14 }
 0x130   : > { %s2915_s14 = smov %s1700_s24  ;;  %s2916_s15 = smov %s1620_s16 }
 0x131   : > { %s2917_s16 = smov %s2919_s19  ;;  %18 = sbr.rel (!%p16_p0) target bundleno = 6 (0x6), region = 110 }
 0x138   :  { %1224 = vsyncpa [#allocation3], 1 }
 0x139   :  { %1226 = vsyncpa [#allocation3 + $0x1], 1 }
 0x13a   :  { %1227 = vsyncpa [#allocation5], 1 }
 0x13b   :  { %1229 = vsyncpa [#allocation5 + $0x1], 1 }

</bundles_post_ra>
